<compile_context>
chip_gen: v7x
topology: tpu7x:2x2x1
jax: 0.10.0
libtpu: 0.0.40
codegen_flags: <defaults>
</compile_context>

<pallas_src>
import jax
import jax.numpy as jnp
from jax import lax
from jax.experimental import pallas as pl
from jax.experimental.pallas import tpu as pltpu


# --------------------------- fused GNN kernel --------------------------------

def _gnn_fused_kernel(x_hbm, w_ref, att_ref, bias_ref, mask_ref, pool_ref,
                      o_ref, h_ref, dma_sem):
    li = pl.program_id(0)

    @pl.when(li == 0)
    def _():
        # x is read exactly once: DMA it straight from HBM into the resident
        # bf16 h scratch instead of carrying it as a tiled input all 3 layers.
        cp = pltpu.make_async_copy(x_hbm, h_ref, dma_sem)
        cp.start()
        cp.wait()

    # H = h @ W   (PyG GATConv lin has bias=False); bf16 operands, f32 MXU acc.
    hw = jnp.dot(h_ref[...], w_ref[...],
                 preferred_element_type=jnp.float32)            # (N, F) f32
    hw_bf = hw.astype(jnp.bfloat16)

    # Attention logits in ONE MXU pass, contracting F against both att rows:
    #   s[:, 0] = att_src . h_j   (source term)
    #   s[:, 1] = att_dst . h_i   (destination term)
    s = lax.dot_general(hw_bf, att_ref[...],
                        (((1,), (1,)), ((), ())),
                        preferred_element_type=jnp.float32)     # (N, 2)
    s_dst = s[:, 1:2]                    # (N, 1)
    s_src = jnp.transpose(s[:, 0:1])     # (1, N) tiny XLU transpose (O(N))

    # e[i, j] = LeakyReLU_0.2( att_dst.h_i + att_src.h_j ), then additive mask
    # (0 for edges / self-loops, -1e30 otherwise; streamed as bf16).
    e = s_dst + s_src                                           # (N, N) f32
    e = jnp.where(e > 0.0, e, 0.2 * e)
    e = e + mask_ref[...].astype(jnp.float32)

    # Row softmax over source nodes (f32), EUP reciprocal for the denominator.
    m = jnp.max(e, axis=-1, keepdims=True)
    p = jnp.exp(e - m)
    alpha = p * pl.reciprocal(jnp.sum(p, axis=-1, keepdims=True), approx=True)

    out = jnp.dot(alpha.astype(jnp.bfloat16), hw_bf,
                  preferred_element_type=jnp.float32) + bias_ref[...]
    # BasicGNN applies ReLU between layers and GNN.forward applies a final ReLU
    # after the stack -> every layer ends in ReLU. Store resident h as bf16.
    h_ref[...] = jnp.maximum(out, 0.0).astype(jnp.bfloat16)

    @pl.when(li == pl.num_programs(0) - 1)
    def _():
        # global_mean_pool fused as a (G,N)@(N,F) averaging matmul epilogue.
        o_ref[...] = jnp.dot(pool_ref[...], h_ref[...],
                             preferred_element_type=jnp.float32).astype(o_ref.dtype)


def gnn_fused(x_bf, w_stack, att_stack, bias_stack, adj_mask, pool_mat):
    n, f_in = x_bf.shape
    num_layers, _, f_out = w_stack.shape
    g = pool_mat.shape[0]
    assert f_in == f_out, "fused layer stack requires in_channels == hidden_channels"

    # Advisory cost hint so XLA overlaps wrapper-side mask/pool construction.
    flops = num_layers * (2 * n * f_in * f_out          # h @ W
                          + 2 * n * f_out * 2           # logits (N,2)
                          + 2 * n * n * f_out) \
            + 2 * g * n * f_out                         # pool epilogue
    transcendentals = num_layers * n * n                # exp in softmax
    bytes_accessed = (x_bf.size * 2 + w_stack.size * 2 + att_stack.size * 2
                      + bias_stack.size * 4 + adj_mask.size * 2
                      + pool_mat.size * 2 + g * f_out * 4)

    return pl.pallas_call(
        _gnn_fused_kernel,
        out_shape=jax.ShapeDtypeStruct((g, f_out), jnp.float32),
        grid=(num_layers,),
        in_specs=[
            pl.BlockSpec(memory_space=pl.ANY),                       # x (HBM, DMA'd once)
            pl.BlockSpec((None, f_in, f_out), lambda l: (l, 0, 0)),  # W_l   (bf16)
            pl.BlockSpec((None, 2, f_out), lambda l: (l, 0, 0)),     # att_l (bf16)
            pl.BlockSpec((None, 1, f_out), lambda l: (l, 0, 0)),     # bias_l (f32)
            pl.BlockSpec((n, n), lambda l: (0, 0)),                  # additive mask (bf16)
            pl.BlockSpec((g, n), lambda l: (0, 0)),                  # pool matrix (bf16)
        ],
        out_specs=pl.BlockSpec((g, f_out), lambda l: (0, 0)),
        scratch_shapes=[
            pltpu.VMEM((n, f_out), jnp.bfloat16),   # resident h (bf16)
            pltpu.SemaphoreType.DMA,                # one-shot x -> h copy
        ],
        compiler_params=pltpu.CompilerParams(
            dimension_semantics=("arbitrary",),      # layer loop is sequential
            vmem_limit_bytes=48 * 1024 * 1024),
        cost_estimate=pl.CostEstimate(flops=flops,
                                      transcendentals=transcendentals,
                                      bytes_accessed=bytes_accessed),
    )(x_bf, w_stack, att_stack, bias_stack, adj_mask, pool_mat)


# --------------------------------- GNN module --------------------------------

def init_gnn_params(key, in_channels=512, hidden_channels=512, num_layers=3):
    params = []
    f_in = in_channels
    for li in range(num_layers):
        k = jax.random.fold_in(key, li)
        kw, ka, kb = jax.random.split(k, 3)
        scale_w = (2.0 / (f_in + hidden_channels)) ** 0.5  # glorot-ish
        w = scale_w * jax.random.normal(kw, (f_in, hidden_channels), jnp.float32)
        att = (1.0 / hidden_channels ** 0.5) * jax.random.normal(
            ka, (2, hidden_channels), jnp.float32)          # [att_src; att_dst]
        bias = 0.01 * jax.random.normal(kb, (1, hidden_channels), jnp.float32)
        params.append((w, att, bias))
        f_in = hidden_channels
    return params


def gnn_forward(x, edge_index, batch, params, num_graphs):
    n = x.shape[0]
    # Additive attention mask with self-loops (GATConv add_self_loops=True):
    # 0 where message j->i exists or i==j, -1e30 otherwise. Streamed as bf16
    # (-1e30 is representable in bf16's f32 exponent range).
    src, dst = edge_index[0], edge_index[1]
    mask = jnp.full((n, n), -1e30, jnp.float32)
    mask = mask.at[dst, src].set(0.0)
    mask = mask.at[jnp.arange(n), jnp.arange(n)].set(0.0)
    mask = mask.astype(jnp.bfloat16)

    # Stack per-layer params; matmul operands go in as bf16 (f32 accumulation
    # inside the kernel), bias stays f32.
    w_stack = jnp.stack([w for (w, _, _) in params]).astype(jnp.bfloat16)
    att_stack = jnp.stack([a for (_, a, _) in params]).astype(jnp.bfloat16)
    bias_stack = jnp.stack([b for (_, _, b) in params]).astype(jnp.float32)

    # global_mean_pool(x, batch) as a dense (G, N) averaging matmul (fused as
    # the kernel's epilogue), streamed as bf16.
    one_hot = (batch[None, :] == jnp.arange(num_graphs)[:, None]).astype(jnp.float32)
    counts = jnp.maximum(jnp.sum(one_hot, axis=1, keepdims=True), 1.0)
    pool_mat = (one_hot / counts).astype(jnp.bfloat16)

    pooled = gnn_fused(x.astype(jnp.bfloat16), w_stack, att_stack, bias_stack,
                       mask, pool_mat)

    # F.dropout(p=0.2, training=self.training): eval mode -> identity.
    # TODO(synk): training-mode dropout would use pltpu.prng_seed/prng_random_bits.
    return pooled


# ------------------------------------ main ------------------------------------

if __name__ == "__main__":
    key = jax.random.PRNGKey(0)
    k_x, k_e, k_p = jax.random.split(key, 3)

    num_graphs = 2
    nodes_per_graph = 64
    n_nodes = num_graphs * nodes_per_graph      # 128 -> fills the MXU M axis
    feat = 512                                  # GAT(in=512, hidden=512)
    edges_per_graph = 24

    x = jax.random.normal(k_x, (n_nodes, feat), jnp.float32)

    edge_chunks = []
    for g in range(num_graphs):
        ks, kd = jax.random.split(jax.random.fold_in(k_e, g))
        s = jax.random.randint(ks, (edges_per_graph,), 0, nodes_per_graph) + g * nodes_per_graph
        d = jax.random.randint(kd, (edges_per_graph,), 0, nodes_per_graph) + g * nodes_per_graph
        edge_chunks.append(jnp.stack([s, d], axis=0))
    edge_index = jnp.concatenate(edge_chunks, axis=1).astype(jnp.int32)  # (2, 48)

    batch = jnp.repeat(jnp.arange(num_graphs, dtype=jnp.int32), nodes_per_graph)  # (128,)

    params = init_gnn_params(k_p, in_channels=feat, hidden_channels=feat, num_layers=3)

    out = gnn_forward(x, edge_index, batch, params, num_graphs)
    out = jax.block_until_ready(out)
    assert out.shape == (num_graphs, feat) and out.dtype == jnp.float32
    assert bool(jnp.all(jnp.isfinite(out)))
    print("KERNEL_OK")
</pallas_src>

<mosaic_0001>
module attributes {stable_mosaic.version = 11 : i64} {
  func.func @_gnn_fused_kernel(%arg0: i32, %arg1: memref<128x512xbf16, #tpu.memory_space<any>>, %arg2: memref<1x512x512xbf16, #tpu.memory_space<vmem>>, %arg3: memref<1x2x512xbf16, #tpu.memory_space<vmem>>, %arg4: memref<1x1x512xf32, #tpu.memory_space<vmem>>, %arg5: memref<128x128xbf16, #tpu.memory_space<vmem>>, %arg6: memref<2x128xbf16, #tpu.memory_space<vmem>>, %arg7: memref<2x512xf32, #tpu.memory_space<vmem>>, %arg8: memref<128x512xbf16, #tpu.memory_space<vmem>>, %arg9: memref<!tpu.dma_semaphore, #tpu.memory_space<semaphore_mem>>) attributes {dimension_semantics = [#tpu.dimension_semantics<arbitrary>], iteration_bounds = array<i64: 3>, scalar_prefetch = 0 : i64, scratch_operands = 2 : i64, tpu.core_type = #tpu.core_type<tc>, window_params = [{}, {transform_indices = @transform_1, window_bounds = array<i64: 1, 512, 512>}, {transform_indices = @transform_2, window_bounds = array<i64: 1, 2, 512>}, {transform_indices = @transform_3, window_bounds = array<i64: 1, 1, 512>}, {pipeline_mode = #tpu.pipeline_mode<synchronous>, transform_indices = @transform_4, window_bounds = array<i64: 128, 128>}, {pipeline_mode = #tpu.pipeline_mode<synchronous>, transform_indices = @transform_5, window_bounds = array<i64: 2, 128>}, {pipeline_mode = #tpu.pipeline_mode<synchronous>, transform_indices = @transform_6, window_bounds = array<i64: 2, 512>}]} {
    %c0_i32 = arith.constant 0 : i32
    %0 = arith.cmpi eq, %arg0, %c0_i32 : i32
    %1 = arith.extui %0 : i1 to i32
    %c0_i32_0 = arith.constant 0 : i32
    %2 = arith.cmpi ne, %1, %c0_i32_0 : i32
    scf.if %2 {
      tpu.enqueue_dma source(%arg1 : memref<128x512xbf16, #tpu.memory_space<any>>) target(%arg8 : memref<128x512xbf16, #tpu.memory_space<vmem>>) target_semaphore(%arg9 : memref<!tpu.dma_semaphore, #tpu.memory_space<semaphore_mem>>)
      tpu.wait_dma2 semaphore(%arg9 : memref<!tpu.dma_semaphore, #tpu.memory_space<semaphore_mem>>) src(%arg1 : memref<128x512xbf16, #tpu.memory_space<any>>) dst(%arg8 : memref<128x512xbf16, #tpu.memory_space<vmem>>)
    } else {
    }
    %c0 = arith.constant 0 : index
    %c0_1 = arith.constant 0 : index
    %3 = vector.load %arg8[%c0, %c0_1] : memref<128x512xbf16, #tpu.memory_space<vmem>>, vector<128x512xbf16>
    %c0_2 = arith.constant 0 : index
    %c0_3 = arith.constant 0 : index
    %c0_4 = arith.constant 0 : index
    %4 = vector.load %arg2[%c0_2, %c0_3, %c0_4] : memref<1x512x512xbf16, #tpu.memory_space<vmem>>, vector<1x512x512xbf16>
    %5 = vector.shape_cast %4 : vector<1x512x512xbf16> to vector<512x512xbf16>
    %cst = arith.constant dense<0.000000e+00> : vector<128x512xf32>
    %6 = tpu.matmul %3, %5, %cst {dimension_numbers = #tpu.dot_dimension_numbers<[1], [0], [0], [1], [0, 0, 1, 1], [], []>} : vector<128x512xbf16>, vector<512x512xbf16>, vector<128x512xf32> -> vector<128x512xf32>
    %7 = arith.truncf %6 : vector<128x512xf32> to vector<128x512xbf16>
    %c0_5 = arith.constant 0 : index
    %c0_6 = arith.constant 0 : index
    %c0_7 = arith.constant 0 : index
    %8 = vector.load %arg3[%c0_5, %c0_6, %c0_7] : memref<1x2x512xbf16, #tpu.memory_space<vmem>>, vector<1x2x512xbf16>
    %9 = vector.shape_cast %8 : vector<1x2x512xbf16> to vector<2x512xbf16>
    %cst_8 = arith.constant dense<0.000000e+00> : vector<128x2xf32>
    %10 = tpu.matmul %7, %9, %cst_8 {dimension_numbers = #tpu.dot_dimension_numbers<[1], [1], [0], [0], [0, 0, 1, 0], [], []>} : vector<128x512xbf16>, vector<2x512xbf16>, vector<128x2xf32> -> vector<128x2xf32>
    %11 = vector.extract_strided_slice %10 {offsets = [0, 1], sizes = [128, 1], strides = [1, 1]} : vector<128x2xf32> to vector<128x1xf32>
    %12 = vector.extract_strided_slice %10 {offsets = [0, 0], sizes = [128, 1], strides = [1, 1]} : vector<128x2xf32> to vector<128x1xf32>
    %13 = tpu.transpose %12, [1, 0] : vector<128x1xf32> -> vector<1x128xf32>
    %14 = vector.broadcast %11 : vector<128x1xf32> to vector<128x128xf32>
    %15 = vector.broadcast %13 : vector<1x128xf32> to vector<128x128xf32>
    %16 = arith.addf %14, %15 : vector<128x128xf32>
    %cst_9 = arith.constant 0.000000e+00 : f32
    %17 = vector.broadcast %cst_9 : f32 to vector<128x128xf32>
    %18 = arith.cmpf ogt, %16, %17 : vector<128x128xf32>
    %cst_10 = arith.constant 2.000000e-01 : f32
    %19 = vector.broadcast %cst_10 : f32 to vector<128x128xf32>
    %20 = arith.mulf %19, %16 : vector<128x128xf32>
    %21 = arith.select %18, %16, %20 : vector<128x128xi1>, vector<128x128xf32>
    %c0_11 = arith.constant 0 : index
    %c0_12 = arith.constant 0 : index
    %22 = vector.load %arg5[%c0_11, %c0_12] : memref<128x128xbf16, #tpu.memory_space<vmem>>, vector<128x128xbf16>
    %23 = arith.extf %22 : vector<128x128xbf16> to vector<128x128xf32>
    %24 = arith.addf %21, %23 : vector<128x128xf32>
    %cst_13 = arith.constant dense<0xFF800000> : vector<128xf32>
    %25 = vector.multi_reduction <maximumf>, %24, %cst_13 [1] : vector<128x128xf32> to vector<128xf32>
    %26 = vector.shape_cast %25 : vector<128xf32> to vector<128x1xf32>
    %27 = vector.broadcast %26 : vector<128x1xf32> to vector<128x128xf32>
    %28 = arith.subf %24, %27 : vector<128x128xf32>
    %29 = math.exp %28 : vector<128x128xf32>
    %cst_14 = arith.constant dense<0.000000e+00> : vector<128xf32>
    %30 = vector.multi_reduction <add>, %29, %cst_14 [1] : vector<128x128xf32> to vector<128xf32>
    %31 = vector.shape_cast %30 : vector<128xf32> to vector<128x1xf32>
    %32 = tpu.reciprocal %31 {approx = true} : vector<128x1xf32> -> vector<128x1xf32>
    %33 = vector.broadcast %32 : vector<128x1xf32> to vector<128x128xf32>
    %34 = arith.mulf %29, %33 : vector<128x128xf32>
    %35 = arith.truncf %34 : vector<128x128xf32> to vector<128x128xbf16>
    %cst_15 = arith.constant dense<0.000000e+00> : vector<128x512xf32>
    %36 = tpu.matmul %35, %7, %cst_15 {dimension_numbers = #tpu.dot_dimension_numbers<[1], [0], [0], [1], [0, 0, 1, 1], [], []>} : vector<128x128xbf16>, vector<128x512xbf16>, vector<128x512xf32> -> vector<128x512xf32>
    %c0_16 = arith.constant 0 : index
    %c0_17 = arith.constant 0 : index
    %c0_18 = arith.constant 0 : index
    %37 = vector.load %arg4[%c0_16, %c0_17, %c0_18] : memref<1x1x512xf32, #tpu.memory_space<vmem>>, vector<1x1x512xf32>
    %38 = vector.shape_cast %37 : vector<1x1x512xf32> to vector<1x512xf32>
    %39 = vector.broadcast %38 : vector<1x512xf32> to vector<128x512xf32>
    %40 = arith.addf %36, %39 : vector<128x512xf32>
    %cst_19 = arith.constant 0.000000e+00 : f32
    %41 = vector.broadcast %cst_19 : f32 to vector<128x512xf32>
    %42 = arith.maximumf %40, %41 : vector<128x512xf32>
    %43 = arith.truncf %42 : vector<128x512xf32> to vector<128x512xbf16>
    %c0_20 = arith.constant 0 : index
    %c0_21 = arith.constant 0 : index
    %44 = vector.load %arg8[%c0_20, %c0_21] : memref<128x512xbf16, #tpu.memory_space<vmem>>, vector<128x512xbf16>
    tpu.vector_store %arg8[%c0_20, %c0_21], %43 {strides = array<i32>} : memref<128x512xbf16, #tpu.memory_space<vmem>>, vector<128x512xbf16>,
    %c2_i32 = arith.constant 2 : i32
    %45 = arith.cmpi eq, %arg0, %c2_i32 : i32
    %46 = arith.extui %45 : i1 to i32
    %c0_i32_22 = arith.constant 0 : i32
    %47 = arith.cmpi ne, %46, %c0_i32_22 : i32
    scf.if %47 {
      %c0_23 = arith.constant 0 : index
      %c0_24 = arith.constant 0 : index
      %48 = vector.load %arg6[%c0_23, %c0_24] : memref<2x128xbf16, #tpu.memory_space<vmem>>, vector<2x128xbf16>
      %c0_25 = arith.constant 0 : index
      %c0_26 = arith.constant 0 : index
      %49 = vector.load %arg8[%c0_25, %c0_26] : memref<128x512xbf16, #tpu.memory_space<vmem>>, vector<128x512xbf16>
      %cst_27 = arith.constant dense<0.000000e+00> : vector<2x512xf32>
      %50 = tpu.matmul %48, %49, %cst_27 {dimension_numbers = #tpu.dot_dimension_numbers<[1], [0], [0], [1], [0, 0, 1, 1], [], []>} : vector<2x128xbf16>, vector<128x512xbf16>, vector<2x512xf32> -> vector<2x512xf32>
      %c0_28 = arith.constant 0 : index
      %c0_29 = arith.constant 0 : index
      %51 = vector.load %arg7[%c0_28, %c0_29] : memref<2x512xf32, #tpu.memory_space<vmem>>, vector<2x512xf32>
      tpu.vector_store %arg7[%c0_28, %c0_29], %50 {strides = array<i32>} : memref<2x512xf32, #tpu.memory_space<vmem>>, vector<2x512xf32>,
    } else {
    }
    return
  }
  func.func @transform_1(%arg0: i32) -> (i32, i32, i32) {
    %c0_i32 = arith.constant 0 : i32
    %c0_i32_0 = arith.constant 0 : i32
    %c0_i32_1 = arith.constant 0 : i32
    return %arg0, %c0_i32, %c0_i32_0 : i32, i32, i32
  }
  func.func @transform_2(%arg0: i32) -> (i32, i32, i32) {
    %c0_i32 = arith.constant 0 : i32
    %c0_i32_0 = arith.constant 0 : i32
    %c0_i32_1 = arith.constant 0 : i32
    return %arg0, %c0_i32, %c0_i32_0 : i32, i32, i32
  }
  func.func @transform_3(%arg0: i32) -> (i32, i32, i32) {
    %c0_i32 = arith.constant 0 : i32
    %c0_i32_0 = arith.constant 0 : i32
    %c0_i32_1 = arith.constant 0 : i32
    return %arg0, %c0_i32, %c0_i32_0 : i32, i32, i32
  }
  func.func @transform_4(%arg0: i32) -> (i32, i32) {
    %c0_i32 = arith.constant 0 : i32
    %c0_i32_0 = arith.constant 0 : i32
    %c0_i32_1 = arith.constant 0 : i32
    return %c0_i32, %c0_i32_0 : i32, i32
  }
  func.func @transform_5(%arg0: i32) -> (i32, i32) {
    %c0_i32 = arith.constant 0 : i32
    %c0_i32_0 = arith.constant 0 : i32
    %c0_i32_1 = arith.constant 0 : i32
    return %c0_i32, %c0_i32_0 : i32, i32
  }
  func.func @transform_6(%arg0: i32) -> (i32, i32) {
    %c0_i32 = arith.constant 0 : i32
    %c0_i32_0 = arith.constant 0 : i32
    %c0_i32_1 = arith.constant 0 : i32
    return %c0_i32, %c0_i32_0 : i32, i32
  }
}

</mosaic_0001>

<bundles_post_ra>
// kernel: tpu_custom_call.1
= control target key start
LH: loop header
LB: loop body
LE: loop exit
PB: predicated region body
PF: predicated region fallthrough
CT: control target
= control target key end

     0   :  { %s4609_s0 = inlined_call_operand.hbm [shape: bf16[128,512], index: 0, kind: input, shape index: {}]   ;;  %s4610_s1 = inlined_call_operand.hbm [shape: bf16[3,512,512], index: 1, kind: input, shape index: {}]   ;;  %s4611_s2 = inlined_call_operand.hbm [shape: bf16[3,2,512], index: 2, kind: input, shape index: {}]   ;;  %s4612_s3 = inlined_call_operand.hbm [shape: f32[3,1,512], index: 3, kind: input, shape index: {}]   ;;  %s4613_s4 = inlined_call_operand.hbm [shape: bf16[128,128], index: 4, kind: input, shape index: {}]   ;;  %s4614_s5 = inlined_call_operand.hbm [shape: bf16[2,128], index: 5, kind: input, shape index: {}]   ;;  %s4615_s6 = inlined_call_operand.hbm [shape: f32[2,512], index: 6, kind: output, shape index: {}]  }
   0x1   :  { %4627 = sst [smem:[#allocation22_spill]] %s4611_s2 }
   0x2   :  { %4628 = sst [smem:[#allocation23_spill]] %s4613_s4 }
   0x3   :  { %11 = vsyncpa [#allocation5], 0 }
   0x4   :  { %13 = vsyncpa [#allocation5 + $0x1], 0 }
   0x5   :  { %14 = vsyncpa [#allocation8], 0 }
   0x6   :  { %16 = vsyncpa [#allocation8 + $0x1], 0 }
   0x7   :  { %17 = vsyncpa [#allocation11], 0 }
   0x8   :  { %18 = vsyncpa [#allocation6], 0  ;;  %s3853_s21 = smov 0   ;;  %s3855_s22 = smov 0  }
   0x9   :  { %s3857_s23 = smov 0   ;;  %s3859_s24 = smov 0  }
   0xa LB: > { %s3872_s25 = sadd.s32 4294967295, %s3792_s24   ;;  %p44_p0 = scmp.ne.s32.totalorder %s3784_s22, %s3780_s21  ;;  %s3792_s24 = sphi %s3859_s24, %s4663_s24   ;;  %s3788_s23 = sphi %s3857_s23, %s4662_s23   ;;  %s3784_s22 = sphi %s3855_s22, %s4661_s22   ;;  %s3780_s21 = sphi %s3853_s21, %s4660_s21  }
   0xb   : > { %p4616_p1 = scmp.eq.s32.totalorder %s3872_s25, 0  ;;  %p2908_p2 = scmp.ge.s32.totalorder %s3792_s24, 1 }
   0xc   : > { %p170_p3 = scmp.lt.s32.totalorder %s3792_s24, 4  ;;  %s3794_s28 = smov [#allocation10]  }
   0xd   : > { %p3880_p4 = por %p4616_p1, %p44_p0  ;;  %s182_s29 = sshll.u32 %s3794_s28, 4  ;;  %s183_s29 = int_to_ptr.vmem [resolvable:$true] %s182_s29 }
   0xe   : > { %p3884_p5 = pnand %p2908_p2, %p170_p3  ;;  %s3897_s7 = sadd.s32 1, %s3792_s24  }
   0xf   : > { %s4629_s26 = scalar_select %p3880_p4, 1, 0 }
  0x10   : > { %s4630_s27 = scalar_select %p3884_p5, 1, 0 }
  0x11   : > { %p3234_p6 = pneg %p3884_p5  ;;  %s31_s8 = sadd.s32 1, %s3788_s23 }
  0x12   : > { %s28_s9 = ssub.s32 %s3792_s24, %s3897_s7  ;;  %s4632_s4 = sld [smem:[#allocation23_spill]] }
  0x13   : > { %p3892_p7 = pnand %p3234_p6, %p4616_p1 }
  0x15   : > { %s4631_s30 = scalar_select %p3892_p7, 1, 0 }
  0x16   : > { %p4620_p9 = pneg %p3892_p7 }
  0x18   : > { %s3570_s12 = scalar_lea.hbm %s4632_s4, 1024 }
  0x19   : > { %p3571_p8 = scmp.ne.s32.totalorder %s4632_s4, %s3570_s12  ;;  %p3577_p12 = scmp.lt.u32.totalorder %s3570_s12, %s4632_s4 }
  0x1b   : > { %p3573_p10 = pnand %p4620_p9, %p3571_p8 }
  0x1d   : > { %p3574_p11 = pneg %p3573_p10 }
  0x1f   : > { %p3579_p13 = pnand %p3577_p12, %p3574_p11 }
  0x21   : > { %3582 = shalt.err (!%p3579_p13)
}
  0x22   : > { %s3583_s17 = scalar_lea.vmem %s183_s29, 1024  ;;  %p3591_p6 = scmp.lt.s32.totalorder %s183_s29, %s183_s29 }
  0x23   : > { %p3584_p0 = scmp.ne.s32.totalorder %s183_s29, %s3583_s17  ;;  %p3592_p1 = scmp.lt.s32.totalorder %s3583_s17, %s3583_s17 }
  0x25   : > { %p3586_p2 = pnand %p3584_p0, %p4620_p9  ;;  %p3593_p4 = por %p3592_p1, %p3591_p6 }
  0x27   : > { %p3587_p3 = pneg %p3586_p2 }
  0x29   : > { %p3594_p5 = pnand %p3593_p4, %p3587_p3 }
  0x2b   : > { %3597 = shalt.err (!%p3594_p5)
}
  0x2c   : > { %s3795_s18 = smov 64   ;;  %s3796_s19 = smov 4  }
  0x2d   : > { %3237 = dma.hbm_to_vmem [thread:$0]  (!%p3892_p7), %s4632_s4, 1024, %s183_s29, [#allocation11], %s3795_s18, %s3795_s18, %s3796_s19  }
  0x2e   : > { %p29_p8 = scmp.eq.s32.totalorder %s28_s9, 0  ;;  %p38_p1 = scmp.ne.s32.totalorder %s3788_s23, %s3784_s22 }
  0x2f   : > { %p39_p4 = scmp.eq.s32.totalorder %s3792_s24, 0  ;;  %p3253_p5 = scmp.lt.s32.totalorder %s3792_s24, 3 }
  0x30   : > { %s3929_s28 = scalar_select %p29_p8, %s3788_s23, %s31_s8  }
  0x31   : > { %p40_p10 = por %p39_p4, %p38_p1  ;;  %s3932_s10 = sand.u32 1, %s3788_s23  }
  0x32   : > { %s228_s11 = sand.u32 1, %s3792_s24   ;;  %s4619_s12 = sshll.u32 %s3932_s10, 2 }
  0x33   : > { %p3936_p11 = pnand %p3253_p5, %p40_p10  ;;  %s3066_s14 = sshll.u32 %s3792_s24, 6 }
  0x34   : > { %s4634_s2 = sld [smem:[#allocation22_spill]]  ;;  %s232_s8 = scalar_lea.vmem [#allocation7], %s4619_s12 }
  0x35   : > { %s4633_s13 = scalar_select %p3936_p11, 1, 0 }
  0x36   : > { %s240_s16 = sshll.u32 %s232_s8, 4  ;;  %s3953_s19 = scalar_lea.hbm %s4612_s3, %s3066_s14  ;;  %s3948_s16 = int_to_ptr.vmem [resolvable:$true] %s240_s16 }
  0x37   : > { %s3955_s20 = scalar_lea.sflag [#allocation8], %s228_s11  ;;  %p3961_p13 = pneg %p3936_p11 }
  0x39   : > { %s4635_s29 = scalar_select %p3961_p13, 1, 0 }
  0x3a   : > { %s3944_s15 = scalar_lea.hbm %s4634_s2, %s3066_s14  ;;  %s3603_s12 = scalar_lea.hbm %s4634_s2, 192 }
  0x3b   : > { %s3598_s21 = scalar_lea.hbm %s3944_s15, 64  ;;  %p3604_p3 = scmp.lt.u32.totalorder %s3944_s15, %s4634_s2 }
  0x3c   : > { %p3599_p12 = scmp.ne.s32.totalorder %s3944_s15, %s3598_s21  ;;  %p3605_p6 = scmp.lt.u32.totalorder %s3603_s12, %s3598_s21 }
  0x3d   : > { %p3607_p1 = scmp.lt.u32.totalorder %s3598_s21, %s3944_s15 }
  0x3e   : > { %p3601_p0 = pnand %p3961_p13, %p3599_p12  ;;  %p3606_p8 = por %p3605_p6, %p3604_p3 }
  0x40   : > { %p3602_p2 = pneg %p3601_p0  ;;  %p3608_p4 = por %p3607_p1, %p3606_p8 }
  0x42   : > { %p3609_p5 = pnand %p3608_p4, %p3602_p2 }
  0x44   : > { %3612 = shalt.err (!%p3609_p5)
}
  0x45   : > { %s3613_s11 = scalar_lea.vmem %s3948_s16, 64  ;;  %s3797_s18 = smov [#allocation7]  }
  0x46   : > { %p3614_p10 = scmp.ne.s32.totalorder %s3948_s16, %s3613_s11  ;;  %s3618_s9 = sshll.u32 %s3797_s18, 4  ;;  %s3619_s9 = int_to_ptr.vmem [resolvable:$false] %s3618_s9 }
  0x47   : > { %s3620_s8 = scalar_lea.vmem %s3619_s9, 128  ;;  %p3621_p9 = scmp.lt.s32.totalorder %s3948_s16, %s3619_s9 }
  0x48   : > { %p3616_p12 = pnand %p3614_p10, %p3961_p13  ;;  %p3622_p7 = scmp.lt.s32.totalorder %s3620_s8, %s3613_s11 }
  0x4a   : > { %p3617_p0 = pneg %p3616_p12  ;;  %p3623_p3 = por %p3622_p7, %p3621_p9 }
  0x4c   : > { %p3624_p6 = pnand %p3623_p3, %p3617_p0 }
  0x4e   : > { %3627 = shalt.err (!%p3624_p6)
}
  0x4f   : > { %3247 = dma.hbm_to_vmem [thread:$0]  (!%p3936_p11), %s3944_s15, 64, %s3948_s16, %s3955_s20  }
  0x50   : > { %s3798_s12 = smov [#allocation12]   ;;  %s2912_s17 = sshll.u32 %s3932_s10, 10 }
  0x51   : > { %s196_s21 = sshll.u32 %s3798_s12, 4  ;;  %s3628_s9 = scalar_lea.hbm %s4614_s5, 16  ;;  %s197_s21 = int_to_ptr.vmem [resolvable:$true] %s196_s21 }
  0x52   : > { %p3629_p7 = scmp.ne.s32.totalorder %s4614_s5, %s3628_s9  ;;  %p4636_p9 = scmp.ne.s32.totalorder %s4631_s30, 0 }
  0x53   : > { %p3635_p4 = scmp.lt.u32.totalorder %s3628_s9, %s4614_s5 }
  0x54   : > { %p4637_p2 = pneg %p4636_p9 }
  0x56   : > { %p3631_p8 = pnand %p3629_p7, %p4637_p2 }
  0x58   : > { %p3632_p1 = pneg %p3631_p8 }
  0x5a   : > { %p3637_p5 = pnand %p3635_p4, %p3632_p1 }
  0x5c   : > { %3640 = shalt.err (!%p3637_p5)
}
  0x5d   : > { %s3641_s15 = scalar_lea.vmem %s197_s21, 16  ;;  %p4638_p12 = pmov %p4637_p2 }
  0x5e   : > { %p3642_p10 = scmp.ne.s32.totalorder %s197_s21, %s3641_s15  ;;  %s3648_s16 = scalar_lea.vmem %s197_s21, 32 }
  0x5f   : > { %p3649_p6 = scmp.lt.s32.totalorder %s197_s21, %s197_s21  ;;  %p3650_p11 = scmp.lt.s32.totalorder %s3648_s16, %s3641_s15 }
  0x60   : > { %p3644_p0 = pnand %p3642_p10, %p4638_p12 }
  0x61   : > { %p3651_p13 = por %p3650_p11, %p3649_p6 }
  0x62   : > { %p3645_p3 = pneg %p3644_p0 }
  0x64   : > { %p3652_p2 = pnand %p3651_p13, %p3645_p3 }
  0x66   : > { %3655 = shalt.err (!%p3652_p2)
}
  0x67   : > { %3240 = dma.hbm_to_vmem [thread:$0]  (!%p4636_p9), %s4614_s5, 16, %s197_s21, [#allocation11]  }
  0x68   : > { %s3065_s4 = sshll.u32 %s3792_s24, 14  ;;  %s211_s14 = scalar_lea.vmem [#allocation4], %s2912_s17 }
  0x69   : > { %s218_s18 = sshll.u32 %s211_s14, 4  ;;  %s4010_s8 = scalar_lea.hbm %s4610_s1, %s3065_s4  ;;  %s4012_s18 = int_to_ptr.vmem [resolvable:$true] %s218_s18 }
  0x6a   : > { %s208_s30 = scalar_lea.sflag [#allocation5], %s3932_s10  ;;  %s3656_s15 = scalar_lea.hbm %s4010_s8, 16384 }
  0x6b   : > { %p3657_p11 = scmp.ne.s32.totalorder %s4010_s8, %s3656_s15  ;;  %p4639_p13 = scmp.ne.s32.totalorder %s4635_s29, 0 }
  0x6c   : > { %s3661_s17 = scalar_lea.hbm %s4610_s1, 49152  ;;  %p3662_p8 = scmp.lt.u32.totalorder %s4010_s8, %s4610_s1 }
  0x6d   : > { %p3659_p7 = pnand %p3657_p11, %p4639_p13  ;;  %p3663_p1 = scmp.lt.u32.totalorder %s3661_s17, %s3656_s15 }
  0x6e   : > { %p3665_p5 = scmp.lt.u32.totalorder %s3656_s15, %s4010_s8 }
  0x6f   : > { %p3660_p9 = pneg %p3659_p7  ;;  %p3664_p4 = por %p3663_p1, %p3662_p8 }
  0x71   : > { %p3666_p10 = por %p3665_p5, %p3664_p4 }
  0x73   : > { %p3667_p12 = pnand %p3666_p10, %p3660_p9 }
  0x75   : > { %3670 = shalt.err (!%p3667_p12)
}
  0x76   : > { %s3671_s2 = scalar_lea.vmem %s4012_s18, 16384  ;;  %s3799_s4 = smov [#allocation4]  }
  0x77   : > { %p3672_p0 = scmp.ne.s32.totalorder %s4012_s18, %s3671_s2  ;;  %s3676_s14 = sshll.u32 %s3799_s4, 4  ;;  %s3677_s14 = int_to_ptr.vmem [resolvable:$false] %s3676_s14 }
  0x78   : > { %s3678_s9 = scalar_lea.vmem %s3677_s14, 32768  ;;  %p3679_p2 = scmp.lt.s32.totalorder %s4012_s18, %s3677_s14 }
  0x79   : > { %p3674_p3 = pnand %p3672_p0, %p4639_p13  ;;  %p3680_p11 = scmp.lt.s32.totalorder %s3678_s9, %s3671_s2 }
  0x7b   : > { %p3675_p6 = pneg %p3674_p3  ;;  %p3681_p7 = por %p3680_p11, %p3679_p2 }
  0x7d   : > { %p3682_p8 = pnand %p3681_p7, %p3675_p6 }
  0x7f   : > { %3685 = shalt.err (!%p3682_p8)
}
  0x80   : > { %s3800_s11 = smov 256   ;;  %s3801_s15 = smov 16  }
  0x81   : > { %p4640_p9 = scmp.ne.s32.totalorder %s4633_s13, 0  ;;  %s4641_s24 = sshll.u32 %s3932_s10, 2 }
  0x82   : > { %s251_s21 = scalar_lea.vmem [#allocation9], %s4641_s24  ;;  %s3686_s16 = scalar_lea.hbm %s3953_s19, 64 }
  0x83   : > { %3244 = dma.hbm_to_vmem [thread:$0]  (!%p4640_p9), %s4010_s8, 16384, %s4012_s18, %s208_s30, %s3800_s11, %s3800_s11, %s3801_s15  }
  0x84   : > { %s259_s17 = sshll.u32 %s251_s21, 4  ;;  %p3687_p1 = scmp.ne.s32.totalorder %s3953_s19, %s3686_s16  ;;  %s260_s17 = int_to_ptr.vmem [resolvable:$true] %s259_s17 }
  0x85   : > { %s3691_s4 = scalar_lea.hbm %s4612_s3, 192  ;;  %p3692_p10 = scmp.lt.u32.totalorder %s3953_s19, %s4612_s3 }
  0x86   : > { %p3689_p4 = pnand %p3687_p1, %p4639_p13  ;;  %p3693_p12 = scmp.lt.u32.totalorder %s3691_s4, %s3686_s16 }
  0x87   : > { %p3695_p3 = scmp.lt.u32.totalorder %s3686_s16, %s3953_s19 }
  0x88   : > { %p3690_p5 = pneg %p3689_p4  ;;  %p3694_p0 = por %p3693_p12, %p3692_p10 }
  0x8a   : > { %p3696_p6 = por %p3695_p3, %p3694_p0 }
  0x8c   : > { %p3697_p2 = pnand %p3696_p6, %p3690_p5 }
  0x8e   : > { %3700 = shalt.err (!%p3697_p2)
}
  0x8f   : > { %s3701_s10 = scalar_lea.vmem %s260_s17, 64  ;;  %s3802_s18 = smov [#allocation9]  }
  0x90   : > { %p3702_p11 = scmp.ne.s32.totalorder %s260_s17, %s3701_s10  ;;  %s3706_s8 = sshll.u32 %s3802_s18, 4  ;;  %s3707_s8 = int_to_ptr.vmem [resolvable:$false] %s3706_s8 }
  0x91   : > { %s3708_s30 = scalar_lea.vmem %s3707_s8, 128  ;;  %p3709_p1 = scmp.lt.s32.totalorder %s260_s17, %s3707_s8 }
  0x92   : > { %p3704_p7 = pnand %p3702_p11, %p4639_p13  ;;  %p3710_p4 = scmp.lt.s32.totalorder %s3708_s30, %s3701_s10 }
  0x94   : > { %p3705_p8 = pneg %p3704_p7  ;;  %p3711_p9 = por %p3710_p4, %p3709_p1 }
  0x96   : > { %p3712_p10 = pnand %p3711_p9, %p3705_p8 }
  0x98   : > { %3715 = shalt.err (!%p3712_p10)
}
  0x99   : > { %p4642_p12 = scmp.ne.s32.totalorder %s4633_s13, 0  ;;  %p4643_p5 = scmp.ne.s32.totalorder %s4630_s27, 0 }
  0x9a   : > { %s270_s29 = sand.u32 (!%p4643_p5), 1, %s3784_s22   ;;  %p4644_p13 = scmp.ne.s32.totalorder (!%p4643_p5), %s4629_s26, 0 }
  0x9b   : > { %3250 = dma.hbm_to_vmem [thread:$0]  (!%p4642_p12), %s3953_s19, 64, %s260_s17, %s3955_s20  }
  0x9c   : > { %268 = sbr.rel (%p4643_p5) target bundleno = 1937 (0x791), region = 40  ;;  %s2922_s11 = sshll.u32 (!%p4643_p5), %s270_s29, 10 }
  0x9d   : > { %s271_s15 = scalar_lea.sflag (!%p4643_p5), [#allocation5], %s270_s29  ;;  %s4061_s24 = scalar_lea.vmem (!%p4643_p5), [#allocation4], %s2922_s11 }
  0xa3   : > { %3759 = dma.done.wait (%p4644_p13), %s271_s15, 16384  }
  0xa4   : > { %3761 = vsyncadd (%p4644_p13), %s271_s15, 4294950912  ;;  %s279_s13 = sand.u32 1, %s3872_s25   ;;  %s2923_s21 = sshll.u32 %s270_s29, 2 }
  0xa5   : > { %s280_s19 = scalar_lea.sflag [#allocation8], %s279_s13  ;;  %s4068_s20 = scalar_lea.vmem [#allocation7], %s2923_s21 }
  0xa6   : > { %3763 = dma.done.wait (%p4644_p13), %s280_s19, 128  }
  0xa7   : > { %3765 = vsyncadd (%p4644_p13), %s280_s19, 4294967168  ;;  %s4074_s27 = scalar_lea.vmem [#allocation9], %s2923_s21  ;;  %p4645_p9 = scmp.eq.s32.totalorder %s3872_s25, 0 }
  0xa9   : > { %3767 = dma.done.wait (%p4645_p9), [#allocation11], 1040   ;;  %p4646_p0 = pmov %p4645_p9 }
  0xab   : > { %3769 = vsyncadd (%p4646_p0), [#allocation11], 4294966256 }
  0xac   : > { %p4647_p3 = pmov %p4646_p0  ;;  %s3803_s26 = smov [#allocation2]  }
  0xad   : > { %s349_s12 = sshll.u32 %s3803_s26, 4  ;;  %s3804_s2 = smov 512   ;;  %s350_s12 = int_to_ptr.vmem [resolvable:$true] %s349_s12 }
  0xae   : > { %s3218_s17 = scalar_select %p4647_p3, [#allocation0], [#allocation16] }
  0xaf   : > { %p4648_p6 = pmov %p4646_p0  ;;  %p4649_p2 = pmov %p4646_p0 }
  0xb0   : > { %s341_s16 = sld [smem:[%s3218_s17]]   ;;  %s3805_s4 = smov 4  }
  0xb1   : > { %3219 = sst [smem:[#allocation15]] (%p4648_p6), %s3804_s2  ;;  %p4650_p11 = pmov %p4646_p0 }
  0xb2   : > { %3220 = sst [smem:[#allocation15 + $0x1]] (%p4649_p2), %s3804_s2  ;;  %s3806_s14 = smov 64  }
  0xb3   : > { %3221 = sst [smem:[#allocation15 + $0x2]] (%p4650_p11), %s3805_s4  ;;  %p4651_p7 = pmov %p4646_p0 }
  0xb4   : > { %s3807_s9 = smov 128   ;;  %p4652_p8 = pmov %p4646_p0 }
  0xb5   : > { %3222 = sst [smem:[#allocation15 + $0x3]] (%p4651_p7), %s3806_s14  ;;  %s3808_s18 = smov 2  }
  0xb6   : > { %3223 = sst [smem:[#allocation15 + $0x4]] (%p4652_p8), %s3807_s9  ;;  %s2928_s10 = sshll.u32 %s341_s16, 26 }
  0xb7   : > { %p4653_p1 = pmov %p4646_p0  ;;  %s2929_s8 = sadd.s32 134217728, %s2928_s10 }
  0xb8   : > { %s3809_s30 = smov 256   ;;  %p4654_p4 = pmov %p4646_p0 }
  0xb9   : > { %3224 = sst [smem:[#allocation15 + $0x5]] (%p4653_p1), %s3808_s18  ;;  %p4655_p10 = pmov %p4646_p0 }
  0xba   : > { %3225 = sst [smem:[#allocation15 + $0x6]] (%p4654_p4), %s3809_s30  ;;  %p4656_p12 = pmov %p4646_p0 }
  0xbb   : > { %3226 = sst [smem:[#allocation15 + $0x7]] (%p4655_p10), %s3806_s14  ;;  %s3810_s29 = smov [#allocation3]  }
  0xbc   : > { %3227 = sst [smem:[#allocation15 + $0x8]] (%p4656_p12), %s3805_s4  ;;  %s3811_s11 = smov [#allocation14]  }
  0xbd   : > { %p4657_p5 = pmov %p4646_p0  ;;  %p4658_p13 = pmov %p4646_p0 }
  0xbf   : > { %3228 = dma.general (%p4657_p5), %s4609_s0, 4096, %s350_s12, %s3810_s29, %s3811_s11, [#allocation15], %s2929_s8, 0  }
  0xc0   : > { %3771 = dma.done.wait (%p4658_p13), [#allocation3], 4096  ;;  %p4659_p9 = pmov %p4646_p0 }
  0xc1   : > { %v3314_v0 = vld [vmem:[%s4061_s24 + $0x4] ss:$16 sps:$4 sm:$0xff]   ;;  %v3316_v1 = vld [vmem:[%s4061_s24 + $0xc] ss:$16 sps:$4 sm:$0xff]   ;;  %v3318_v2 = vld [vmem:[%s4061_s24] ss:$16 sps:$4 sm:$0xff]  }
  0xc2   : > { %3773 = vsyncadd (%p4659_p9), [#allocation3], 4294963200  ;;  %1176 = vmatprep.subr.bf16.mxu0 %v3314_v0  ;;  %v3319_v3 = vld [vmem:[%s4061_s24 + $0x8] ss:$16 sps:$4 sm:$0xff]   ;;  %1402 = vmatprep.subr.bf16.mxu1 %v3316_v1  ;;  %v3320_v4 = vld [vmem:[%s4061_s24 + $0x24] ss:$16 sps:$4 sm:$0xff]  }
  0xc3   : > { %1177 = vmatpush1.bf16.msra.mxu0 %v3318_v2  ;;  %1403 = vmatpush1.bf16.msra.mxu1 %v3319_v3  ;;  %v3322_v5 = vld [vmem:[%s4061_s24 + $0x2c] ss:$16 sps:$4 sm:$0xff]   ;;  %v3324_v6 = vld [vmem:[%s4061_s24 + $0x20] ss:$16 sps:$4 sm:$0xff]   ;;  %v3325_v7 = vld [vmem:[%s4061_s24 + $0x28] ss:$16 sps:$4 sm:$0xff]  }
  0xc4   : > { %1178 = vmatprep.subr.bf16.mxu0 %v3320_v4  ;;  %1404 = vmatprep.subr.bf16.mxu1 %v3322_v5  ;;  %v3326_v8 = vld [vmem:[%s4061_s24 + $0x44] ss:$16 sps:$4 sm:$0xff]   ;;  %v3328_v9 = vld [vmem:[%s4061_s24 + $0x4c] ss:$16 sps:$4 sm:$0xff]   ;;  %v3330_v10 = vld [vmem:[%s4061_s24 + $0x40] ss:$16 sps:$4 sm:$0xff]  }
  0xc5   : > { %v3331_v11 = vld [vmem:[%s4061_s24 + $0x48] ss:$16 sps:$4 sm:$0xff]   ;;  %v3332_v12 = vld [vmem:[%s4061_s24 + $0x64] ss:$16 sps:$4 sm:$0xff]   ;;  %v3334_v13 = vld [vmem:[%s4061_s24 + $0x6c] ss:$16 sps:$4 sm:$0xff]  }
  0xc6   : > { %v3336_v14 = vld [vmem:[%s4061_s24 + $0x60] ss:$16 sps:$4 sm:$0xff]   ;;  %v3337_v15 = vld [vmem:[%s4061_s24 + $0x68] ss:$16 sps:$4 sm:$0xff]   ;;  %v3338_v16 = vld [vmem:[%s4061_s24 + $0x84] ss:$16 sps:$4 sm:$0xff]  }
  0xc7   : > { %1179 = vmatpush1.bf16.msra.mxu0 %v3324_v6  ;;  %1405 = vmatpush1.bf16.msra.mxu1 %v3325_v7  ;;  %v3340_v17 = vld [vmem:[%s4061_s24 + $0x8c] ss:$16 sps:$4 sm:$0xff]   ;;  %v3342_v18 = vld [vmem:[%s4061_s24 + $0x80] ss:$16 sps:$4 sm:$0xff]   ;;  %v3343_v19 = vld [vmem:[%s4061_s24 + $0x88] ss:$16 sps:$4 sm:$0xff]  }
  0xc8   : > { %1180 = vmatprep.subr.bf16.mxu0 %v3326_v8  ;;  %1406 = vmatprep.subr.bf16.mxu1 %v3328_v9  ;;  %v3344_v20 = vld [vmem:[%s4061_s24 + $0xa4] ss:$16 sps:$4 sm:$0xff]   ;;  %v3346_v21 = vld [vmem:[%s4061_s24 + $0xac] ss:$16 sps:$4 sm:$0xff]   ;;  %v3348_v22 = vld [vmem:[%s4061_s24 + $0xa0] ss:$16 sps:$4 sm:$0xff]  }
  0xc9   : > { %v3349_v23 = vld [vmem:[%s4061_s24 + $0xa8] ss:$16 sps:$4 sm:$0xff]   ;;  %v3350_v24 = vld [vmem:[%s4061_s24 + $0xc4] ss:$16 sps:$4 sm:$0xff]   ;;  %v3352_v25 = vld [vmem:[%s4061_s24 + $0xcc] ss:$16 sps:$4 sm:$0xff]  }
  0xca   : > { %v3354_v26 = vld [vmem:[%s4061_s24 + $0xc0] ss:$16 sps:$4 sm:$0xff]   ;;  %v3355_v27 = vld [vmem:[%s4061_s24 + $0xc8] ss:$16 sps:$4 sm:$0xff]   ;;  %v3356_v28 = vld [vmem:[%s4061_s24 + $0xe4] ss:$16 sps:$4 sm:$0xff]  }
  0xcb   : > { %1181 = vmatpush1.bf16.msra.mxu0 %v3330_v10  ;;  %1407 = vmatpush1.bf16.msra.mxu1 %v3331_v11  ;;  %v3358_v29 = vld [vmem:[%s4061_s24 + $0xec] ss:$16 sps:$4 sm:$0xff]   ;;  %v3360_v30 = vld [vmem:[%s4061_s24 + $0xe0] ss:$16 sps:$4 sm:$0xff]   ;;  %v3361_v31 = vld [vmem:[%s4061_s24 + $0xe8] ss:$16 sps:$4 sm:$0xff]  }
  0xcc   : > { %1182 = vmatprep.subr.bf16.mxu0 %v3332_v12  ;;  %1408 = vmatprep.subr.bf16.mxu1 %v3334_v13  ;;  %v3362_v32 = vld [vmem:[%s4061_s24 + $0x104] ss:$16 sps:$4 sm:$0xff]   ;;  %v3364_v33 = vld [vmem:[%s4061_s24 + $0x10c] ss:$16 sps:$4 sm:$0xff]   ;;  %v3366_v34 = vld [vmem:[%s4061_s24 + $0x100] ss:$16 sps:$4 sm:$0xff]  }
  0xcd   : > { %v3367_v35 = vld [vmem:[%s4061_s24 + $0x108] ss:$16 sps:$4 sm:$0xff]   ;;  %v3368_v36 = vld [vmem:[%s4061_s24 + $0x124] ss:$16 sps:$4 sm:$0xff]   ;;  %v3370_v37 = vld [vmem:[%s4061_s24 + $0x12c] ss:$16 sps:$4 sm:$0xff]  }
  0xce   : > { %v3372_v38 = vld [vmem:[%s4061_s24 + $0x120] ss:$16 sps:$4 sm:$0xff]   ;;  %v3373_v39 = vld [vmem:[%s4061_s24 + $0x128] ss:$16 sps:$4 sm:$0xff]   ;;  %v3374_v40 = vld [vmem:[%s4061_s24 + $0x144] ss:$16 sps:$4 sm:$0xff]  }
  0xcf   : > { %1183 = vmatpush1.bf16.msra.mxu0 %v3336_v14  ;;  %1409 = vmatpush1.bf16.msra.mxu1 %v3337_v15  ;;  %v3376_v41 = vld [vmem:[%s4061_s24 + $0x14c] ss:$16 sps:$4 sm:$0xff]   ;;  %v3378_v42 = vld [vmem:[%s4061_s24 + $0x140] ss:$16 sps:$4 sm:$0xff]   ;;  %v3379_v43 = vld [vmem:[%s4061_s24 + $0x148] ss:$16 sps:$4 sm:$0xff]  }
  0xd0   : > { %1184 = vmatprep.subr.bf16.mxu0 %v3338_v16  ;;  %1410 = vmatprep.subr.bf16.mxu1 %v3340_v17  ;;  %v3380_v44 = vld [vmem:[%s4061_s24 + $0x164] ss:$16 sps:$4 sm:$0xff]   ;;  %v3382_v45 = vld [vmem:[%s4061_s24 + $0x16c] ss:$16 sps:$4 sm:$0xff]   ;;  %v3384_v47 = vld [vmem:[%s4061_s24 + $0x160] ss:$16 sps:$4 sm:$0xff]  }
  0xd1   : > { %v377_v46 = vld [vmem:[#allocation2 + $0x8] sm:$0xff]  ;;  %v3386_v49 = vld [vmem:[%s4061_s24 + $0x184] ss:$16 sps:$4 sm:$0xff]   ;;  %v3390_v51 = vld [vmem:[%s4061_s24 + $0x180] ss:$16 sps:$4 sm:$0xff]   ;;  %p3059_p0 = scmp.ne.s32.totalorder %s3872_s25, 2 }
  0xd2   : > { %1208 = vmatprep.mubr.bf16.mxu0 %v377_v46  ;;  %1434 = vmatprep.mubr.bf16.mxu1 %v377_v46  ;;  %v3385_v48 = vld [vmem:[%s4061_s24 + $0x168] ss:$16 sps:$4 sm:$0xff]   ;;  %v3388_v50 = vld [vmem:[%s4061_s24 + $0x18c] ss:$16 sps:$4 sm:$0xff]   ;;  %v3392_v53 = vld [vmem:[%s4061_s24 + $0x1a4] ss:$16 sps:$4 sm:$0xff]  }
  0xd3   : > { %1185 = vmatpush1.bf16.msra.mxu0 %v3342_v18  ;;  %1411 = vmatpush1.bf16.msra.mxu1 %v3343_v19  ;;  %v3391_v52 = vld [vmem:[%s4061_s24 + $0x188] ss:$16 sps:$4 sm:$0xff]   ;;  %v3394_v54 = vld [vmem:[%s4061_s24 + $0x1ac] ss:$16 sps:$4 sm:$0xff]   ;;  %v3396_v55 = vld [vmem:[%s4061_s24 + $0x1a0] ss:$16 sps:$4 sm:$0xff]  }
  0xd4   : > { %1186 = vmatprep.subr.bf16.mxu0 %v3344_v20  ;;  %1412 = vmatprep.subr.bf16.mxu1 %v3346_v21  ;;  %v3397_v56 = vld [vmem:[%s4061_s24 + $0x1a8] ss:$16 sps:$4 sm:$0xff]   ;;  %v3398_v57 = vld [vmem:[%s4061_s24 + $0x1c4] ss:$16 sps:$4 sm:$0xff]   ;;  %v3400_v58 = vld [vmem:[%s4061_s24 + $0x1cc] ss:$16 sps:$4 sm:$0xff]  }
  0xd5   : > { %v3402_v59 = vld [vmem:[%s4061_s24 + $0x1c0] ss:$16 sps:$4 sm:$0xff]   ;;  %v3403_v60 = vld [vmem:[%s4061_s24 + $0x1c8] ss:$16 sps:$4 sm:$0xff]   ;;  %v3404_v61 = vld [vmem:[%s4061_s24 + $0x1e4] ss:$16 sps:$4 sm:$0xff]  }
  0xd6   : > { %v3406_v62 = vld [vmem:[%s4061_s24 + $0x1ec] ss:$16 sps:$4 sm:$0xff]   ;;  %v3408_v63 = vld [vmem:[%s4061_s24 + $0x1e0] ss:$16 sps:$4 sm:$0xff]   ;;  %v3409_v0 = vld [vmem:[%s4061_s24 + $0x1e8] ss:$16 sps:$4 sm:$0xff]  }
  0xd7   : > { %1187 = vmatpush1.bf16.msra.mxu0 %v3348_v22  ;;  %1413 = vmatpush1.bf16.msra.mxu1 %v3349_v23  ;;  %v3412_v1 = vld [vmem:[%s4061_s24 + $0x204] ss:$16 sps:$4 sm:$0xff]   ;;  %v3415_v2 = vld [vmem:[%s4061_s24 + $0x20c] ss:$16 sps:$4 sm:$0xff]   ;;  %v3410_v4 = vld [vmem:[%s4061_s24 + $0x200] ss:$16 sps:$4 sm:$0xff]  }
  0xd8   : > { %1188 = vmatprep.subr.bf16.mxu0 %v3350_v24  ;;  %1414 = vmatprep.subr.bf16.mxu1 %v3352_v25  ;;  %v376_v3 = vld [vmem:[#allocation2] sm:$0xff]  ;;  %v3413_v5 = vld [vmem:[%s4061_s24 + $0x208] ss:$16 sps:$4 sm:$0xff]   ;;  %v3421_v7 = vld [vmem:[%s4061_s24 + $0x22c] ss:$16 sps:$4 sm:$0xff]  }
  0xd9   : > { %v3418_v6 = vld [vmem:[%s4061_s24 + $0x224] ss:$16 sps:$4 sm:$0xff]   ;;  %v381_v8 = vld [vmem:[#allocation2 + $0x28] sm:$0xff]  ;;  %v3416_v9 = vld [vmem:[%s4061_s24 + $0x220] ss:$16 sps:$4 sm:$0xff]  }
  0xda   : > { %v3419_v10 = vld [vmem:[%s4061_s24 + $0x228] ss:$16 sps:$4 sm:$0xff]   ;;  %v3424_v11 = vld [vmem:[%s4061_s24 + $0x244] ss:$16 sps:$4 sm:$0xff]   ;;  %v3427_v12 = vld [vmem:[%s4061_s24 + $0x24c] ss:$16 sps:$4 sm:$0xff]  }
  0xdb   : > { %1189 = vmatpush1.bf16.msra.mxu0 %v3354_v26  ;;  %1415 = vmatpush1.bf16.msra.mxu1 %v3355_v27  ;;  %v380_v13 = vld [vmem:[#allocation2 + $0x20] sm:$0xff]  ;;  %v3425_v15 = vld [vmem:[%s4061_s24 + $0x248] ss:$16 sps:$4 sm:$0xff]   ;;  %v3433_v17 = vld [vmem:[%s4061_s24 + $0x26c] ss:$16 sps:$4 sm:$0xff]  }
  0xdc   : > { %1190 = vmatprep.subr.bf16.mxu0 %v3356_v28  ;;  %1416 = vmatprep.subr.bf16.mxu1 %v3358_v29  ;;  %v3422_v14 = vld [vmem:[%s4061_s24 + $0x240] ss:$16 sps:$4 sm:$0xff]   ;;  %v3430_v16 = vld [vmem:[%s4061_s24 + $0x264] ss:$16 sps:$4 sm:$0xff]   ;;  %v3431_v19 = vld [vmem:[%s4061_s24 + $0x268] ss:$16 sps:$4 sm:$0xff]  }
  0xdd   : > { %v3428_v18 = vld [vmem:[%s4061_s24 + $0x260] ss:$16 sps:$4 sm:$0xff]   ;;  %v385_v20 = vld [vmem:[#allocation2 + $0x48] sm:$0xff]  ;;  %v3436_v21 = vld [vmem:[%s4061_s24 + $0x284] ss:$16 sps:$4 sm:$0xff]  }
  0xde   : > { %v3439_v22 = vld [vmem:[%s4061_s24 + $0x28c] ss:$16 sps:$4 sm:$0xff]   ;;  %v384_v23 = vld [vmem:[#allocation2 + $0x40] sm:$0xff]  ;;  %v3437_v25 = vld [vmem:[%s4061_s24 + $0x288] ss:$16 sps:$4 sm:$0xff]  }
  0xdf   : > { %1191 = vmatpush1.bf16.msra.mxu0 %v3360_v30  ;;  %1417 = vmatpush1.bf16.msra.mxu1 %v3361_v31  ;;  %v3434_v24 = vld [vmem:[%s4061_s24 + $0x280] ss:$16 sps:$4 sm:$0xff]   ;;  %v3442_v26 = vld [vmem:[%s4061_s24 + $0x2a4] ss:$16 sps:$4 sm:$0xff]   ;;  %v3445_v27 = vld [vmem:[%s4061_s24 + $0x2ac] ss:$16 sps:$4 sm:$0xff]  }
  0xe0   : > { %1192 = vmatprep.subr.bf16.mxu0 %v3362_v32  ;;  %1418 = vmatprep.subr.bf16.mxu1 %v3364_v33  ;;  %v389_v28 = vld [vmem:[#allocation2 + $0x68] sm:$0xff]  ;;  %v3440_v29 = vld [vmem:[%s4061_s24 + $0x2a0] ss:$16 sps:$4 sm:$0xff]   ;;  %v3448_v31 = vld [vmem:[%s4061_s24 + $0x2c4] ss:$16 sps:$4 sm:$0xff]  }
  0xe1   : > { %v3443_v30 = vld [vmem:[%s4061_s24 + $0x2a8] ss:$16 sps:$4 sm:$0xff]   ;;  %v3451_v32 = vld [vmem:[%s4061_s24 + $0x2cc] ss:$16 sps:$4 sm:$0xff]   ;;  %v388_v33 = vld [vmem:[#allocation2 + $0x60] sm:$0xff] }
  0xe2   : > { %v3466_v46 = vld [vmem:[%s4061_s24 + $0x324] ss:$16 sps:$4 sm:$0xff]  }
  0xe3   : > { %1193 = vmatpush1.bf16.msra.mxu0 %v3366_v34  ;;  %1419 = vmatpush1.bf16.msra.mxu1 %v3367_v35  ;;  %v3446_v34 = vld [vmem:[%s4061_s24 + $0x2c0] ss:$16 sps:$4 sm:$0xff]   ;;  %v3449_v35 = vld [vmem:[%s4061_s24 + $0x2c8] ss:$16 sps:$4 sm:$0xff]  }
  0xe4   : > { %1194 = vmatprep.subr.bf16.mxu0 %v3368_v36  ;;  %1420 = vmatprep.subr.bf16.mxu1 %v3370_v37  ;;  %v3454_v36 = vld [vmem:[%s4061_s24 + $0x2e4] ss:$16 sps:$4 sm:$0xff]   ;;  %v3457_v37 = vld [vmem:[%s4061_s24 + $0x2ec] ss:$16 sps:$4 sm:$0xff]  }
  0xe7   : > { %1195 = vmatpush1.bf16.msra.mxu0 %v3372_v38  ;;  %1421 = vmatpush1.bf16.msra.mxu1 %v3373_v39  ;;  %v393_v38 = vld [vmem:[#allocation2 + $0x88] sm:$0xff]  ;;  %v3452_v39 = vld [vmem:[%s4061_s24 + $0x2e0] ss:$16 sps:$4 sm:$0xff]  }
  0xe8   : > { %1196 = vmatprep.subr.bf16.mxu0 %v3374_v40  ;;  %1422 = vmatprep.subr.bf16.mxu1 %v3376_v41  ;;  %v3455_v40 = vld [vmem:[%s4061_s24 + $0x2e8] ss:$16 sps:$4 sm:$0xff]   ;;  %v3460_v41 = vld [vmem:[%s4061_s24 + $0x304] ss:$16 sps:$4 sm:$0xff]  }
  0xeb   : > { %1197 = vmatpush1.bf16.msra.mxu0 %v3378_v42  ;;  %1423 = vmatpush1.bf16.msra.mxu1 %v3379_v43  ;;  %v3463_v42 = vld [vmem:[%s4061_s24 + $0x30c] ss:$16 sps:$4 sm:$0xff]   ;;  %v392_v43 = vld [vmem:[#allocation2 + $0x80] sm:$0xff] }
  0xec   : > { %1198 = vmatprep.subr.bf16.mxu0 %v3380_v44  ;;  %1424 = vmatprep.subr.bf16.mxu1 %v3382_v45  ;;  %v3458_v44 = vld [vmem:[%s4061_s24 + $0x300] ss:$16 sps:$4 sm:$0xff]   ;;  %v3461_v45 = vld [vmem:[%s4061_s24 + $0x308] ss:$16 sps:$4 sm:$0xff]  }
  0xef   : > { %1199 = vmatpush1.bf16.msra.mxu0 %v3384_v47  ;;  %1425 = vmatpush1.bf16.msra.mxu1 %v3385_v48  ;;  %v3469_v47 = vld [vmem:[%s4061_s24 + $0x32c] ss:$16 sps:$4 sm:$0xff]  }
  0xf0   : > { %1200 = vmatprep.subr.bf16.mxu0 %v3386_v49  ;;  %1426 = vmatprep.subr.bf16.mxu1 %v3388_v50  ;;  %v397_v48 = vld [vmem:[#allocation2 + $0xa8] sm:$0xff]  ;;  %v3464_v49 = vld [vmem:[%s4061_s24 + $0x320] ss:$16 sps:$4 sm:$0xff]  }
  0xf1   : > { %v3467_v50 = vld [vmem:[%s4061_s24 + $0x328] ss:$16 sps:$4 sm:$0xff]  }
  0xf3   : > { %1201 = vmatpush1.bf16.msra.mxu0 %v3390_v51  ;;  %1427 = vmatpush1.bf16.msra.mxu1 %v3391_v52  ;;  %v3472_v51 = vld [vmem:[%s4061_s24 + $0x344] ss:$16 sps:$4 sm:$0xff]   ;;  %v3475_v52 = vld [vmem:[%s4061_s24 + $0x34c] ss:$16 sps:$4 sm:$0xff]  }
  0xf4   : > { %1202 = vmatprep.subr.bf16.mxu0 %v3392_v53  ;;  %1428 = vmatprep.subr.bf16.mxu1 %v3394_v54  ;;  %v396_v53 = vld [vmem:[#allocation2 + $0xa0] sm:$0xff] }
  0xf5   : > { %v3470_v54 = vld [vmem:[%s4061_s24 + $0x340] ss:$16 sps:$4 sm:$0xff]  }
  0xf7   : > { %1203 = vmatpush1.bf16.msra.mxu0 %v3396_v55  ;;  %1429 = vmatpush1.bf16.msra.mxu1 %v3397_v56  ;;  %v3473_v55 = vld [vmem:[%s4061_s24 + $0x348] ss:$16 sps:$4 sm:$0xff]   ;;  %v3478_v56 = vld [vmem:[%s4061_s24 + $0x364] ss:$16 sps:$4 sm:$0xff]  }
  0xf8   : > { %1204 = vmatprep.subr.bf16.mxu0 %v3398_v57  ;;  %1430 = vmatprep.subr.bf16.mxu1 %v3400_v58  ;;  %v3481_v57 = vld [vmem:[%s4061_s24 + $0x36c] ss:$16 sps:$4 sm:$0xff]  }
  0xf9   : > { %v401_v58 = vld [vmem:[#allocation2 + $0xc8] sm:$0xff] }
  0xfb   : > { %1205 = vmatpush1.bf16.msra.mxu0 %v3402_v59  ;;  %1431 = vmatpush1.bf16.msra.mxu1 %v3403_v60  ;;  %v3476_v59 = vld [vmem:[%s4061_s24 + $0x360] ss:$16 sps:$4 sm:$0xff]   ;;  %v3479_v60 = vld [vmem:[%s4061_s24 + $0x368] ss:$16 sps:$4 sm:$0xff]  }
  0xfc   : > { %1206 = vmatprep.subr.bf16.mxu0 %v3404_v61  ;;  %1432 = vmatprep.subr.bf16.mxu1 %v3406_v62  ;;  %v3484_v61 = vld [vmem:[%s4061_s24 + $0x384] ss:$16 sps:$4 sm:$0xff]   ;;  %v3487_v62 = vld [vmem:[%s4061_s24 + $0x38c] ss:$16 sps:$4 sm:$0xff]  }
  0xff   : > { %1207 = vmatpush1.bf16.msra.mxu0 %v3408_v63  ;;  %1433 = vmatpush1.bf16.msra.mxu1 %v3409_v0  ;;  %v400_v63 = vld [vmem:[#allocation2 + $0xc0] sm:$0xff] }
 0x100   : > { %1289 = vmatprep.subr.bf16.mxu0 %v3412_v1  ;;  %1515 = vmatprep.subr.bf16.mxu1 %v3415_v2  ;;  %v3482_v0 = vld [vmem:[%s4061_s24 + $0x380] ss:$16 sps:$4 sm:$0xff]   ;;  %v3485_v1 = vld [vmem:[%s4061_s24 + $0x388] ss:$16 sps:$4 sm:$0xff]   ;;  %v3490_v2 = vld [vmem:[%s4061_s24 + $0x3a4] ss:$16 sps:$4 sm:$0xff]  }
 0x102   : > { %1209 = vmatmul.mubr.bf16.vlgmr.msra.gmra.mrb[0].mxu0 %v376_v3  ;;  %1435 = vmatmul.mubr.bf16.vlgmr.msra.gmra.mrb[0].mxu1 %v376_v3  ;;  %v3493_v3 = vld [vmem:[%s4061_s24 + $0x3ac] ss:$16 sps:$4 sm:$0xff]  }
 0x103   : > { %1290 = vmatpush1.bf16.msra.mxu0 %v3410_v4  ;;  %1516 = vmatpush1.bf16.msra.mxu1 %v3413_v5  ;;  %v3812_v4 = vmov 1966171168  }
 0x104   : > { %1291 = vmatprep.subr.bf16.mxu0 %v3418_v6  ;;  %1517 = vmatprep.subr.bf16.mxu1 %v3421_v7  ;;  %v1671_v5 = vunpack.c.l.s4 %v3812_v4  ;;  %v1673_v6 = vlaneseq  ;;  %v405_v7 = vld [vmem:[#allocation2 + $0xe8] sm:$0xff] }
 0x105   : > { %1218 = vmatprep.mubr.bf16.mxu0 %v381_v8  ;;  %1444 = vmatprep.mubr.bf16.mxu1 %v381_v8  ;;  %v3488_v8 = vld [vmem:[%s4061_s24 + $0x3a0] ss:$16 sps:$4 sm:$0xff]  }
 0x107   : > { %1292 = vmatpush1.bf16.msra.mxu0 %v3416_v9  ;;  %1518 = vmatpush1.bf16.msra.mxu1 %v3419_v10  ;;  %v3491_v9 = vld [vmem:[%s4061_s24 + $0x3a8] ss:$16 sps:$4 sm:$0xff]   ;;  %v3496_v10 = vld [vmem:[%s4061_s24 + $0x3c4] ss:$16 sps:$4 sm:$0xff]  }
 0x108   : > { %1293 = vmatprep.subr.bf16.mxu0 %v3424_v11  ;;  %1519 = vmatprep.subr.bf16.mxu1 %v3427_v12  ;;  %v3499_v11 = vld [vmem:[%s4061_s24 + $0x3cc] ss:$16 sps:$4 sm:$0xff]   ;;  %v1672_v12 = vunpack.c.0.s8 %v1671_v5 }
 0x10a   : > { %1219 = vmatmul.mubr.bf16.gmra.mrb[4].mxu0 %v380_v13  ;;  %1445 = vmatmul.mubr.bf16.gmra.mrb[4].mxu1 %v380_v13  ;;  %v4231_v13 = vshrl.u32 %v1673_v6, 7 }
 0x10b   : > { %1294 = vmatpush1.bf16.msra.mxu0 %v3422_v14  ;;  %1520 = vmatpush1.bf16.msra.mxu1 %v3425_v15  ;;  %v3058_v14 = vld.sshfl [vmem:[%s4068_s20] sm:$0x33 pattern:$0x75316420] }
 0x10c   : > { %1295 = vmatprep.subr.bf16.mxu0 %v3430_v16  ;;  %1521 = vmatprep.subr.bf16.mxu1 %v3433_v17  ;;  %v404_v15 = vld [vmem:[#allocation2 + $0xe0] sm:$0xff]  ;;  %v3497_v17 = vld [vmem:[%s4061_s24 + $0x3c8] ss:$16 sps:$4 sm:$0xff]  }
 0x10d   : > { %1228 = vmatprep.mubr.bf16.mxu0 %v385_v20  ;;  %1454 = vmatprep.mubr.bf16.mxu1 %v385_v20  ;;  %v3494_v16 = vld [vmem:[%s4061_s24 + $0x3c0] ss:$16 sps:$4 sm:$0xff]   ;;  %v1669_v20 = vcombine.high %v3058_v14, %v3058_v14 }
 0x10f   : > { %1296 = vmatpush1.bf16.msra.mxu0 %v3428_v18  ;;  %1522 = vmatpush1.bf16.msra.mxu1 %v3431_v19  ;;  %v3502_v18 = vld [vmem:[%s4061_s24 + $0x3e4] ss:$16 sps:$4 sm:$0xff]   ;;  %v3505_v19 = vld [vmem:[%s4061_s24 + $0x3ec] ss:$16 sps:$4 sm:$0xff]  }
 0x110   : > { %1297 = vmatprep.subr.bf16.mxu0 %v3436_v21  ;;  %1523 = vmatprep.subr.bf16.mxu1 %v3439_v22  ;;  %v1675_v21 = vsub.s32 %v1672_v12, %v4231_v13  ;;  %v379_v22 = vld [vmem:[#allocation2 + $0x18] sm:$0xff] }
 0x112   : > { %1229 = vmatmul.mubr.bf16.gmra.mrb[8].mxu0 %v384_v23  ;;  %1455 = vmatmul.mubr.bf16.gmra.mrb[8].mxu1 %v384_v23  ;;  %v3500_v23 = vld [vmem:[%s4061_s24 + $0x3e0] ss:$16 sps:$4 sm:$0xff]  }
 0x113   : > { %1298 = vmatpush1.bf16.msra.mxu0 %v3434_v24  ;;  %1524 = vmatpush1.bf16.msra.mxu1 %v3437_v25  ;;  %v3503_v24 = vld [vmem:[%s4061_s24 + $0x3e8] ss:$16 sps:$4 sm:$0xff]   ;;  %v1683_v25 = vrot.slane %v1669_v20, %v1675_v21 }
 0x114   : > { %1299 = vmatprep.subr.bf16.mxu0 %v3442_v26  ;;  %1525 = vmatprep.subr.bf16.mxu1 %v3445_v27  ;;  %v378_v26 = vld [vmem:[#allocation2 + $0x10] sm:$0xff]  ;;  %v383_v27 = vld [vmem:[#allocation2 + $0x38] sm:$0xff] }
 0x115   : > { %1238 = vmatprep.mubr.bf16.mxu0 %v389_v28  ;;  %1464 = vmatprep.mubr.bf16.mxu1 %v389_v28  ;;  %v4241_v28 = vrot.slane %v3058_v14, %v1675_v21 }
 0x117   : > { %1300 = vmatpush1.bf16.msra.mxu0 %v3440_v29  ;;  %1526 = vmatpush1.bf16.msra.mxu1 %v3443_v30  ;;  %v382_v29 = vld [vmem:[#allocation2 + $0x30] sm:$0xff]  ;;  %v387_v30 = vld [vmem:[#allocation2 + $0x58] sm:$0xff] }
 0x118   : > { %1301 = vmatprep.subr.bf16.mxu0 %v3448_v31  ;;  %1527 = vmatprep.subr.bf16.mxu1 %v3451_v32  ;;  %v386_v31 = vld [vmem:[#allocation2 + $0x50] sm:$0xff]  ;;  %v391_v32 = vld [vmem:[#allocation2 + $0x78] sm:$0xff] }
 0x11a   : > { %1239 = vmatmul.mubr.bf16.gmra.mrb[12].mxu0 %v388_v33  ;;  %1465 = vmatmul.mubr.bf16.gmra.mrb[12].mxu1 %v388_v33  ;;  %v390_v33 = vld [vmem:[#allocation2 + $0x70] sm:$0xff] }
 0x11b   : > { %1302 = vmatpush1.bf16.msra.mxu0 %v3446_v34  ;;  %1528 = vmatpush1.bf16.msra.mxu1 %v3449_v35  ;;  %v395_v34 = vld [vmem:[#allocation2 + $0x98] sm:$0xff]  ;;  %v394_v35 = vld [vmem:[#allocation2 + $0x90] sm:$0xff] }
 0x11c   : > { %1303 = vmatprep.subr.bf16.mxu0 %v3454_v36  ;;  %1529 = vmatprep.subr.bf16.mxu1 %v3457_v37  ;;  %v399_v36 = vld [vmem:[#allocation2 + $0xb8] sm:$0xff]  ;;  %v398_v37 = vld [vmem:[#allocation2 + $0xb0] sm:$0xff] }
 0x11d   : > { %1248 = vmatprep.mubr.bf16.mxu0 %v393_v38  ;;  %1474 = vmatprep.mubr.bf16.mxu1 %v393_v38  ;;  %v403_v38 = vld [vmem:[#allocation2 + $0xd8] sm:$0xff] }
 0x11f   : > { %1304 = vmatpush1.bf16.msra.mxu0 %v3452_v39  ;;  %1530 = vmatpush1.bf16.msra.mxu1 %v3455_v40  ;;  %v402_v39 = vld [vmem:[#allocation2 + $0xd0] sm:$0xff]  ;;  %v407_v40 = vld [vmem:[#allocation2 + $0xf8] sm:$0xff] }
 0x120   : > { %1305 = vmatprep.subr.bf16.mxu0 %v3460_v41  ;;  %1531 = vmatprep.subr.bf16.mxu1 %v3463_v42  ;;  %v406_v41 = vld [vmem:[#allocation2 + $0xf0] sm:$0xff]  ;;  %v1685_v42 = vcombine.high %v1683_v25, %v1683_v25 }
 0x122   : > { %1249 = vmatmul.mubr.bf16.gmra.mrb[16].mxu0 %v392_v43  ;;  %1475 = vmatmul.mubr.bf16.gmra.mrb[16].mxu1 %v392_v43 }
 0x123   : > { %1306 = vmatpush1.bf16.msra.mxu0 %v3458_v44  ;;  %1532 = vmatpush1.bf16.msra.mxu1 %v3461_v45  ;;  %v3813_v45 = vmov 1  }
 0x124   : > { %1307 = vmatprep.subr.bf16.mxu0 %v3466_v46  ;;  %1533 = vmatprep.subr.bf16.mxu1 %v3469_v47 }
 0x125   : > { %1258 = vmatprep.mubr.bf16.mxu0 %v397_v48  ;;  %1484 = vmatprep.mubr.bf16.mxu1 %v397_v48 }
 0x126   : > { %3312 = vset.pattern.permute.xlu0 %v3813_v45  ;;  %3313 = vset.pattern.permute.xlu1 %v3813_v45 }
 0x127   : > { %1308 = vmatpush1.bf16.msra.mxu0 %v3464_v49  ;;  %1534 = vmatpush1.bf16.msra.mxu1 %v3467_v50 }
 0x128   : > { %1309 = vmatprep.subr.bf16.mxu0 %v3472_v51  ;;  %1535 = vmatprep.subr.bf16.mxu1 %v3475_v52 }
 0x12a   : > { %1259 = vmatmul.mubr.bf16.gmra.mrb[20].mxu0 %v396_v53  ;;  %1485 = vmatmul.mubr.bf16.gmra.mrb[20].mxu1 %v396_v53 }
 0x12b   : > { %1310 = vmatpush1.bf16.msra.mxu0 %v3470_v54  ;;  %1536 = vmatpush1.bf16.msra.mxu1 %v3473_v55 }
 0x12c   : > { %1311 = vmatprep.subr.bf16.mxu0 %v3478_v56  ;;  %1537 = vmatprep.subr.bf16.mxu1 %v3481_v57  ;;  %v1684_v56 = vcombine.high %v4241_v28, %v4241_v28 }
 0x12d   : > { %1268 = vmatprep.mubr.bf16.mxu0 %v401_v58  ;;  %1494 = vmatprep.mubr.bf16.mxu1 %v401_v58 }
 0x12f   : > { %1312 = vmatpush1.bf16.msra.mxu0 %v3476_v59  ;;  %1538 = vmatpush1.bf16.msra.mxu1 %v3479_v60 }
 0x130   : > { %1313 = vmatprep.subr.bf16.mxu0 %v3484_v61  ;;  %1539 = vmatprep.subr.bf16.mxu1 %v3487_v62 }
 0x132   : > { %1269 = vmatmul.mubr.bf16.gmra.mrb[24].mxu0 %v400_v63  ;;  %1495 = vmatmul.mubr.bf16.gmra.mrb[24].mxu1 %v400_v63 }
 0x133   : > { %1314 = vmatpush1.bf16.msra.mxu0 %v3482_v0  ;;  %1540 = vmatpush1.bf16.msra.mxu1 %v3485_v1 }
 0x134   : > { %1315 = vmatprep.subr.bf16.mxu0 %v3490_v2  ;;  %1541 = vmatprep.subr.bf16.mxu1 %v3493_v3 }
 0x135   : > { %1278 = vmatprep.mubr.bf16.mxu0 %v405_v7  ;;  %1504 = vmatprep.mubr.bf16.mxu1 %v405_v7 }
 0x137   : > { %1316 = vmatpush1.bf16.msra.mxu0 %v3488_v8  ;;  %1542 = vmatpush1.bf16.msra.mxu1 %v3491_v9 }
 0x138   : > { %1317 = vmatprep.subr.bf16.mxu0 %v3496_v10  ;;  %1543 = vmatprep.subr.bf16.mxu1 %v3499_v11 }
 0x13a   : > { %1279 = vmatmul.mubr.bf16.gmra.mrb[28].mxu0 %v404_v15  ;;  %1505 = vmatmul.mubr.bf16.gmra.mrb[28].mxu1 %v404_v15 }
 0x13b   : > { %1318 = vmatpush1.bf16.msra.mxu0 %v3494_v16  ;;  %1544 = vmatpush1.bf16.msra.mxu1 %v3497_v17 }
 0x13c   : > { %1319 = vmatprep.subr.bf16.mxu0 %v3502_v18  ;;  %1545 = vmatprep.subr.bf16.mxu1 %v3505_v19 }
 0x13d   : > { %1321 = vmatprep.mubr.bf16.mxu0 %v379_v22  ;;  %1547 = vmatprep.mubr.bf16.mxu1 %v379_v22 }
 0x13f   : > { %1320 = vmatpush1.bf16.msra.mxu0 %v3500_v23  ;;  %1546 = vmatpush1.bf16.msra.mxu1 %v3503_v24 }
 0x140   : > { %1690 = vmatprep.subr.bf16.mxu0 %v1683_v25 }
 0x142   : > { %1322 = vmatmul.mubr.bf16.vlgmr.msra.gmra.mrb[0].mxu0 %v378_v26  ;;  %1548 = vmatmul.mubr.bf16.vlgmr.msra.gmra.mrb[0].mxu1 %v378_v26 }
 0x143   : > { %1331 = vmatprep.mubr.bf16.mxu0 %v383_v27  ;;  %1557 = vmatprep.mubr.bf16.mxu1 %v383_v27 }
 0x148   : > { %1691 = vmatpush1.bf16.xpose.msra.mxu0 %v4241_v28 }
 0x149   : > { %1787 = vmatprep.subr.bf16.mxu0 %v1685_v42 }
 0x14a   : > { %1332 = vmatmul.mubr.bf16.gmra.mrb[4].mxu0 %v382_v29  ;;  %1558 = vmatmul.mubr.bf16.gmra.mrb[4].mxu1 %v382_v29 }
 0x14b   : > { %1341 = vmatprep.mubr.bf16.mxu0 %v387_v30  ;;  %1567 = vmatprep.mubr.bf16.mxu1 %v387_v30 }
 0x152   : > { %1342 = vmatmul.mubr.bf16.gmra.mrb[8].mxu0 %v386_v31  ;;  %1568 = vmatmul.mubr.bf16.gmra.mrb[8].mxu1 %v386_v31 }
 0x153   : > { %1351 = vmatprep.mubr.bf16.mxu0 %v391_v32  ;;  %1577 = vmatprep.mubr.bf16.mxu1 %v391_v32 }
 0x15a   : > { %1352 = vmatmul.mubr.bf16.gmra.mrb[12].mxu0 %v390_v33  ;;  %1578 = vmatmul.mubr.bf16.gmra.mrb[12].mxu1 %v390_v33 }
 0x15b   : > { %1361 = vmatprep.mubr.bf16.mxu0 %v395_v34  ;;  %1587 = vmatprep.mubr.bf16.mxu1 %v395_v34 }
 0x162   : > { %1362 = vmatmul.mubr.bf16.gmra.mrb[16].mxu0 %v394_v35  ;;  %1588 = vmatmul.mubr.bf16.gmra.mrb[16].mxu1 %v394_v35 }
 0x163   : > { %1371 = vmatprep.mubr.bf16.mxu0 %v399_v36  ;;  %1597 = vmatprep.mubr.bf16.mxu1 %v399_v36 }
 0x16a   : > { %1372 = vmatmul.mubr.bf16.gmra.mrb[20].mxu0 %v398_v37  ;;  %1598 = vmatmul.mubr.bf16.gmra.mrb[20].mxu1 %v398_v37 }
 0x16b   : > { %1381 = vmatprep.mubr.bf16.mxu0 %v403_v38  ;;  %1607 = vmatprep.mubr.bf16.mxu1 %v403_v38 }
 0x172   : > { %1382 = vmatmul.mubr.bf16.gmra.mrb[24].mxu0 %v402_v39  ;;  %1608 = vmatmul.mubr.bf16.gmra.mrb[24].mxu1 %v402_v39 }
 0x173   : > { %1391 = vmatprep.mubr.bf16.mxu0 %v407_v40  ;;  %1617 = vmatprep.mubr.bf16.mxu1 %v407_v40 }
 0x17a   : > { %1392 = vmatmul.mubr.bf16.gmra.mrb[28].mxu0 %v406_v41  ;;  %1618 = vmatmul.mubr.bf16.gmra.mrb[28].mxu1 %v406_v41 }
 0x215   : > { %v1323_v43 = vpop.f32.mrb[0].mxu0  ;;  %v1549_v44 = vpop.f32.mrb[0].mxu1 }
 0x216   : > { %v1325_v46 = vpop.f32.mrb[1].mxu0  ;;  %v1551_v47 = vpop.f32.mrb[1].mxu1 }
 0x217   : > { %v1327_v48 = vpop.f32.mrb[2].mxu0  ;;  %v1553_v49 = vpop.f32.mrb[2].mxu1 }
 0x218   : > { %v1628_v50 = vpack.c.bf16 %v1327_v48, %v1323_v43  ;;  %v4244_v51 = vpack.c.bf16 %v1553_v49, %v1549_v44  ;;  %v1329_v52 = vpop.f32.mrb[3].mxu0  ;;  %v1555_v53 = vpop.f32.mrb[3].mxu1 }
 0x219   : > { %v1629_v54 = vpack.c.bf16 %v1329_v52, %v1325_v46  ;;  %v4246_v55 = vpack.c.bf16 %v1555_v53, %v1551_v47 }
 0x21b   : > { %1722 = vmatprep.mubr.bf16.mxu0 %v1629_v54  ;;  %2286 = vmatprep.subr.bf16.mxu1 %v1629_v54 }
 0x21c   : > { %1723 = vmatmul.mubr.bf16.vlgmr.msra.gmra.mrb[32].mxu0 %v1628_v50  ;;  %2287 = vmatpush1.bf16.msra.mxu1 %v1628_v50 }
 0x21d   : > { %v1333_v57 = vpop.f32.mrb[4].mxu0  ;;  %v1559_v58 = vpop.f32.mrb[4].mxu1  ;;  %1788 = vmatpush1.bf16.xpose.msra.mxu0 %v1684_v56 }
 0x21e   : > { %v1335_v59 = vpop.f32.mrb[5].mxu0  ;;  %v1561_v60 = vpop.f32.mrb[5].mxu1 }
 0x21f   : > { %v1337_v61 = vpop.f32.mrb[6].mxu0  ;;  %v1563_v62 = vpop.f32.mrb[6].mxu1 }
 0x220   : > { %v1632_v63 = vpack.c.bf16 %v1337_v61, %v1333_v57  ;;  %v4250_v0 = vpack.c.bf16 %v1563_v62, %v1559_v58  ;;  %v1339_v1 = vpop.f32.mrb[7].mxu0  ;;  %v1565_v2 = vpop.f32.mrb[7].mxu1 }
 0x221   : > { %v1633_v3 = vpack.c.bf16 %v1339_v1, %v1335_v59  ;;  %v4252_v4 = vpack.c.bf16 %v1565_v2, %v1561_v60 }
 0x223   : > { %1730 = vmatprep.mubr.bf16.mxu0 %v1633_v3  ;;  %2288 = vmatprep.subr.bf16.mxu1 %v1633_v3 }
 0x224   : > { %1731 = vmatmul.mubr.bf16.gmra.mrb[36].mxu0 %v1632_v63  ;;  %2289 = vmatpush1.bf16.msra.mxu1 %v1632_v63 }
 0x225   : > { %v1343_v5 = vpop.f32.mrb[8].mxu0  ;;  %v1569_v6 = vpop.f32.mrb[8].mxu1 }
 0x226   : > { %v1345_v7 = vpop.f32.mrb[9].mxu0  ;;  %v1571_v8 = vpop.f32.mrb[9].mxu1 }
 0x227   : > { %v1347_v9 = vpop.f32.mrb[10].mxu0  ;;  %v1573_v10 = vpop.f32.mrb[10].mxu1 }
 0x228   : > { %v1636_v11 = vpack.c.bf16 %v1347_v9, %v1343_v5  ;;  %v4254_v12 = vpack.c.bf16 %v1573_v10, %v1569_v6  ;;  %v1349_v14 = vpop.f32.mrb[11].mxu0  ;;  %v1575_v15 = vpop.f32.mrb[11].mxu1 }
 0x229   : > { %v1637_v16 = vpack.c.bf16 %v1349_v14, %v1345_v7  ;;  %v4256_v17 = vpack.c.bf16 %v1575_v15, %v1571_v8 }
 0x22b   : > { %1738 = vmatprep.mubr.bf16.mxu0 %v1637_v16  ;;  %2290 = vmatprep.subr.bf16.mxu1 %v1637_v16 }
 0x22c   : > { %1739 = vmatmul.mubr.bf16.gmra.mrb[40].mxu0 %v1636_v11  ;;  %2291 = vmatpush1.bf16.msra.mxu1 %v1636_v11 }
 0x22d   : > { %v1353_v18 = vpop.f32.mrb[12].mxu0  ;;  %v1579_v19 = vpop.f32.mrb[12].mxu1 }
 0x22e   : > { %v1355_v20 = vpop.f32.mrb[13].mxu0  ;;  %v1581_v21 = vpop.f32.mrb[13].mxu1 }
 0x22f   : > { %v1357_v22 = vpop.f32.mrb[14].mxu0  ;;  %v1583_v23 = vpop.f32.mrb[14].mxu1 }
 0x230   : > { %v1640_v24 = vpack.c.bf16 %v1357_v22, %v1353_v18  ;;  %v4258_v25 = vpack.c.bf16 %v1583_v23, %v1579_v19  ;;  %v1359_v26 = vpop.f32.mrb[15].mxu0  ;;  %v1585_v27 = vpop.f32.mrb[15].mxu1 }
 0x231   : > { %v1641_v28 = vpack.c.bf16 %v1359_v26, %v1355_v20  ;;  %v4260_v29 = vpack.c.bf16 %v1585_v27, %v1581_v21 }
 0x233   : > { %1746 = vmatprep.mubr.bf16.mxu0 %v1641_v28  ;;  %2292 = vmatprep.subr.bf16.mxu1 %v1641_v28 }
 0x234   : > { %1747 = vmatmul.mubr.bf16.gmra.mrb[44].mxu0 %v1640_v24  ;;  %2293 = vmatpush1.bf16.msra.mxu1 %v1640_v24 }
 0x235   : > { %v1363_v30 = vpop.f32.mrb[16].mxu0  ;;  %v1589_v31 = vpop.f32.mrb[16].mxu1 }
 0x236   : > { %v1365_v32 = vpop.f32.mrb[17].mxu0  ;;  %v1591_v33 = vpop.f32.mrb[17].mxu1 }
 0x237   : > { %v1367_v34 = vpop.f32.mrb[18].mxu0  ;;  %v1593_v35 = vpop.f32.mrb[18].mxu1 }
 0x238   : > { %v1644_v36 = vpack.c.bf16 %v1367_v34, %v1363_v30  ;;  %v4262_v37 = vpack.c.bf16 %v1593_v35, %v1589_v31  ;;  %v1369_v38 = vpop.f32.mrb[19].mxu0  ;;  %v1595_v39 = vpop.f32.mrb[19].mxu1 }
 0x239   : > { %v1645_v40 = vpack.c.bf16 %v1369_v38, %v1365_v32  ;;  %v4264_v41 = vpack.c.bf16 %v1595_v39, %v1591_v33 }
 0x23b   : > { %1754 = vmatprep.mubr.bf16.mxu0 %v1645_v40  ;;  %2294 = vmatprep.subr.bf16.mxu1 %v1645_v40 }
 0x23c   : > { %1755 = vmatmul.mubr.bf16.gmra.mrb[48].mxu0 %v1644_v36  ;;  %2295 = vmatpush1.bf16.msra.mxu1 %v1644_v36 }
 0x23d   : > { %v1373_v42 = vpop.f32.mrb[20].mxu0  ;;  %v1599_v43 = vpop.f32.mrb[20].mxu1 }
 0x23e   : > { %v1375_v44 = vpop.f32.mrb[21].mxu0  ;;  %v1601_v45 = vpop.f32.mrb[21].mxu1 }
 0x23f   : > { %v1377_v46 = vpop.f32.mrb[22].mxu0  ;;  %v1603_v47 = vpop.f32.mrb[22].mxu1 }
 0x240   : > { %v1648_v48 = vpack.c.bf16 %v1377_v46, %v1373_v42  ;;  %v4266_v49 = vpack.c.bf16 %v1603_v47, %v1599_v43  ;;  %v1379_v50 = vpop.f32.mrb[23].mxu0  ;;  %v1605_v52 = vpop.f32.mrb[23].mxu1 }
 0x241   : > { %v1649_v53 = vpack.c.bf16 %v1379_v50, %v1375_v44  ;;  %v4268_v54 = vpack.c.bf16 %v1605_v52, %v1601_v45 }
 0x243   : > { %1762 = vmatprep.mubr.bf16.mxu0 %v1649_v53  ;;  %2296 = vmatprep.subr.bf16.mxu1 %v1649_v53 }
 0x244   : > { %1763 = vmatmul.mubr.bf16.gmra.mrb[52].mxu0 %v1648_v48  ;;  %2297 = vmatpush1.bf16.msra.mxu1 %v1648_v48 }
 0x245   : > { %v1383_v56 = vpop.f32.mrb[24].mxu0  ;;  %v1609_v57 = vpop.f32.mrb[24].mxu1 }
 0x246   : > { %v1385_v58 = vpop.f32.mrb[25].mxu0  ;;  %v1611_v59 = vpop.f32.mrb[25].mxu1 }
 0x247   : > { %v1387_v60 = vpop.f32.mrb[26].mxu0  ;;  %v1613_v61 = vpop.f32.mrb[26].mxu1 }
 0x248   : > { %v1652_v62 = vpack.c.bf16 %v1387_v60, %v1383_v56  ;;  %v4270_v63 = vpack.c.bf16 %v1613_v61, %v1609_v57  ;;  %v1389_v1 = vpop.f32.mrb[27].mxu0  ;;  %v1615_v2 = vpop.f32.mrb[27].mxu1 }
 0x249   : > { %v1653_v3 = vpack.c.bf16 %v1389_v1, %v1385_v58  ;;  %v4272_v5 = vpack.c.bf16 %v1615_v2, %v1611_v59 }
 0x24b   : > { %1770 = vmatprep.mubr.bf16.mxu0 %v1653_v3  ;;  %2298 = vmatprep.subr.bf16.mxu1 %v1653_v3 }
 0x24c   : > { %1771 = vmatmul.mubr.bf16.gmra.mrb[56].mxu0 %v1652_v62  ;;  %2299 = vmatpush1.bf16.msra.mxu1 %v1652_v62 }
 0x24d   : > { %v1393_v6 = vpop.f32.mrb[28].mxu0  ;;  %v1619_v7 = vpop.f32.mrb[28].mxu1 }
 0x24e   : > { %v1395_v8 = vpop.f32.mrb[29].mxu0  ;;  %v1621_v9 = vpop.f32.mrb[29].mxu1 }
 0x24f   : > { %v1397_v10 = vpop.f32.mrb[30].mxu0  ;;  %v1623_v11 = vpop.f32.mrb[30].mxu1 }
 0x250   : > { %v1656_v14 = vpack.c.bf16 %v1397_v10, %v1393_v6  ;;  %v4274_v15 = vpack.c.bf16 %v1623_v11, %v1619_v7  ;;  %v1399_v16 = vpop.f32.mrb[31].mxu0  ;;  %v1625_v18 = vpop.f32.mrb[31].mxu1  ;;  %v1998_v6 = vsub.s32 0, %v4231_v13  ;;  %v4300_v10 = vld [vmem:[#allocation10 + $0x18] sm:$0xff]  }
 0x251   : > { %v1657_v19 = vpack.c.bf16 %v1399_v16, %v1395_v8  ;;  %v4276_v20 = vpack.c.bf16 %v1625_v18, %v1621_v9 }
 0x253   : > { %1778 = vmatprep.mubr.bf16.mxu0 %v1657_v19  ;;  %2300 = vmatprep.subr.bf16.mxu1 %v1657_v19 }
 0x254   : > { %1779 = vmatmul.mubr.bf16.gmra.mrb[60].mxu0 %v1656_v14  ;;  %2301 = vmatpush1.bf16.msra.mxu1 %v1656_v14  ;;  %v3069_v14 = vld [vmem:[#allocation10] sm:$0xff]  }
 0x255   : > { %1819 = vmatprep.mubr.bf16.mxu0 %v4246_v55  ;;  %2399 = vmatprep.subr.bf16.mxu1 %v4246_v55 }
 0x25c   : > { %1820 = vmatmul.mubr.bf16.vlgmr.msra.gmra.mrb[32].mxu0 %v4244_v51 }
 0x25d   : > { %1827 = vmatprep.mubr.bf16.mxu0 %v4252_v4 }
 0x264   : > { %1828 = vmatmul.mubr.bf16.gmra.mrb[36].mxu0 %v4250_v0 }
 0x265   : > { %1835 = vmatprep.mubr.bf16.mxu0 %v4256_v17 }
 0x26c   : > { %1836 = vmatmul.mubr.bf16.gmra.mrb[40].mxu0 %v4254_v12 }
 0x26d   : > { %1843 = vmatprep.mubr.bf16.mxu0 %v4260_v29 }
 0x274   : > { %1844 = vmatmul.mubr.bf16.gmra.mrb[44].mxu0 %v4258_v25 }
 0x275   : > { %1851 = vmatprep.mubr.bf16.mxu0 %v4264_v41 }
 0x27c   : > { %1852 = vmatmul.mubr.bf16.gmra.mrb[48].mxu0 %v4262_v37 }
 0x27d   : > { %1859 = vmatprep.mubr.bf16.mxu0 %v4268_v54 }
 0x284   : > { %1860 = vmatmul.mubr.bf16.gmra.mrb[52].mxu0 %v4266_v49 }
 0x285   : > { %1867 = vmatprep.mubr.bf16.mxu0 %v4272_v5 }
 0x28c   : > { %1868 = vmatmul.mubr.bf16.gmra.mrb[56].mxu0 %v4270_v63 }
 0x28d   : > { %1875 = vmatprep.mubr.bf16.mxu0 %v4276_v20 }
 0x294   : > { %1876 = vmatmul.mubr.bf16.gmra.mrb[60].mxu0 %v4274_v15 }
 0x32f   : > { %v1821_v55 = vpop.f32.mrb[32].mxu0 }
 0x330   : > { %1918 = vperm.xlu0 %3312, %v1821_v55   ;;  %v1823_v21 = vpop.f32.mrb[33].mxu0 }
 0x331   : > { %v1824_v22 = vpop.f32.mrb[34].mxu0 }
 0x332   : > { %v1826_v23 = vpop.f32.mrb[35].mxu0 }
 0x334   : > { %1923 = vperm.xlu0 %3312, %v1824_v22  }
 0x337   : > { %v1829_v24 = vpop.f32.mrb[36].mxu0 }
 0x338   : > { %1928 = vperm.xlu1 %3313, %v1829_v24   ;;  %v1831_v26 = vpop.f32.mrb[37].mxu0 }
 0x339   : > { %v1832_v27 = vpop.f32.mrb[38].mxu0 }
 0x33a   : > { %v1834_v28 = vpop.f32.mrb[39].mxu0 }
 0x33c   : > { %1933 = vperm.xlu1 %3313, %v1832_v27  }
 0x33f   : > { %v1837_v30 = vpop.f32.mrb[40].mxu0 }
 0x340   : > { %1938 = vperm.xlu0 %3312, %v1837_v30   ;;  %v1839_v31 = vpop.f32.mrb[41].mxu0 }
 0x341   : > { %v1840_v32 = vpop.f32.mrb[42].mxu0 }
 0x342   : > { %1943 = vperm.xlu1 %3313, %v1840_v32   ;;  %v1842_v33 = vpop.f32.mrb[43].mxu0 }
 0x343   : > { %v3071_v33 = vunpack.c.h.bf16 %v3069_v14 }
 0x347   : > { %v1845_v34 = vpop.f32.mrb[44].mxu0 }
 0x348   : > { %1948 = vperm.xlu0 %3312, %v1845_v34   ;;  %v1847_v35 = vpop.f32.mrb[45].mxu0 }
 0x349   : > { %v1848_v36 = vpop.f32.mrb[46].mxu0 }
 0x34a   : > { %1953 = vperm.xlu1 %3313, %v1848_v36   ;;  %v1850_v38 = vpop.f32.mrb[47].mxu0 }
 0x34f   : > { %v1853_v39 = vpop.f32.mrb[48].mxu0 }
 0x350   : > { %1958 = vperm.xlu1 %3313, %v1853_v39   ;;  %v1855_v40 = vpop.f32.mrb[49].mxu0 }
 0x351   : > { %v1856_v42 = vpop.f32.mrb[50].mxu0 }
 0x352   : > { %v1858_v43 = vpop.f32.mrb[51].mxu0 }
 0x354   : > { %1963 = vperm.xlu1 %3313, %v1856_v42  }
 0x357   : > { %v1861_v44 = vpop.f32.mrb[52].mxu0 }
 0x358   : > { %1968 = vperm.xlu1 %3313, %v1861_v44   ;;  %v1863_v45 = vpop.f32.mrb[53].mxu0 }
 0x359   : > { %v1864_v46 = vpop.f32.mrb[54].mxu0 }
 0x35a   : > { %v1866_v47 = vpop.f32.mrb[55].mxu0 }
 0x35c   : > { %1973 = vperm.xlu1 %3313, %v1864_v46  }
 0x35f   : > { %v1869_v48 = vpop.f32.mrb[56].mxu0 }
 0x360   : > { %1978 = vperm.xlu1 %3313, %v1869_v48   ;;  %v1871_v50 = vpop.f32.mrb[57].mxu0 }
 0x361   : > { %v1872_v52 = vpop.f32.mrb[58].mxu0 }
 0x362   : > { %v1874_v53 = vpop.f32.mrb[59].mxu0 }
 0x364   : > { %1983 = vperm.xlu1 %3313, %v1872_v52  }
 0x366   : > { %1884 = vxpose.xlu0.b32.start [1/16] (narrow) %v1821_v55, 8  ;;  %v3083_v55 = vunpack.c.h.bf16 %v4300_v10 }
 0x367   : > { %v1877_v56 = vpop.f32.mrb[60].mxu0 }
 0x368   : > { %1988 = vperm.xlu1 %3313, %v1877_v56   ;;  %v1879_v57 = vpop.f32.mrb[61].mxu0 }
 0x369   : > { %v1880_v58 = vpop.f32.mrb[62].mxu0 }
 0x36a   : > { %1885 = vxpose.xlu0.b32.cont [2/16] (narrow) %v1824_v22, 8  ;;  %v1882_v59 = vpop.f32.mrb[63].mxu0  ;;  %v3070_v22 = vunpack.c.l.bf16 %v3069_v14 }
 0x36c   : > { %1993 = vperm.xlu1 %3313, %v1880_v58  }
 0x36e   : > { %1886 = vxpose.xlu0.b32.cont [3/16] (narrow) %v1829_v24, 8 }
 0x372   : > { %1887 = vxpose.xlu0.b32.cont [4/16] (narrow) %v1832_v27, 8 }
 0x376   : > { %1888 = vxpose.xlu0.b32.cont [5/16] (narrow) %v1837_v30, 8 }
 0x37a   : > { %1889 = vxpose.xlu0.b32.cont [6/16] (narrow) %v1840_v32, 8 }
 0x37e   : > { %1890 = vxpose.xlu0.b32.cont [7/16] (narrow) %v1845_v34, 8 }
 0x382   : > { %1891 = vxpose.xlu0.b32.cont [8/16] (narrow) %v1848_v36, 8  ;;  %v3100_v36 = vld [vmem:[#allocation10 + $0x8] sm:$0xff]  }
 0x383   : > { %v3074_v40 = vunpack.c.l.bf16 %v3100_v36  ;;  %v3075_v47 = vunpack.c.h.bf16 %v3100_v36 }
 0x386   : > { %1892 = vxpose.xlu0.b32.cont [9/16] (narrow) %v1853_v39, 8 }
 0x38a   : > { %1893 = vxpose.xlu0.b32.cont [10/16] (narrow) %v1856_v42, 8 }
 0x38e   : > { %1894 = vxpose.xlu0.b32.cont [11/16] (narrow) %v1861_v44, 8 }
 0x392   : > { %1895 = vxpose.xlu0.b32.cont [12/16] (narrow) %v1864_v46, 8 }
 0x396   : > { %1896 = vxpose.xlu0.b32.cont [13/16] (narrow) %v1869_v48, 8 }
 0x39a   : > { %1897 = vxpose.xlu0.b32.cont [14/16] (narrow) %v1872_v52, 8  ;;  %v3101_v52 = vld [vmem:[#allocation10 + $0x10] sm:$0xff]  }
 0x39e   : > { %1898 = vxpose.xlu0.b32.cont [15/16] (narrow) %v1877_v56, 8 }
 0x3a2   : > { %1899 = vxpose.xlu0.b32.end [16/16] (narrow) %v1880_v58, 8  ;;  %v3078_v58 = vunpack.c.l.bf16 %v3101_v52 }
 0x3af   : > { %v1919_v60 = vpop.permute.xlu0 %1918 }
 0x3b3   : > { %v1924_v61 = vpop.permute.xlu0 %1923 }
 0x3b7   : > { %v1929_v62 = vpop.permute.xlu1 %1928 }
 0x3bb   : > { %v1934_v2 = vpop.permute.xlu1 %1933 }
 0x3bf   : > { %v1939_v1 = vpop.permute.xlu0 %1938 }
 0x3c1   : > { %v1944_v7 = vpop.permute.xlu1 %1943 }
 0x3c7   : > { %v1949_v3 = vpop.permute.xlu0 %1948 }
 0x3c9   : > { %v1954_v11 = vpop.permute.xlu1 %1953 }
 0x3cf   : > { %v1959_v31 = vpop.permute.xlu1 %1958 }
 0x3d3   : > { %v1964_v45 = vpop.permute.xlu1 %1963 }
 0x3d7   : > { %v1969_v56 = vpop.permute.xlu1 %1968 }
 0x3e6   : > { %v1900_v8 = vpop.trf.xlu0 }
 0x3e7   : > { %v4298_v9 = vrot.slane %v1900_v8, %v1998_v6 }
 0x3e9   : > { %v2007_v16 = vadd.f32 %v4298_v9, %v1954_v11  ;;  %v2000_v18 = vadd.f32 %v4298_v9, %v1919_v60  ;;  %v2001_v19 = vadd.f32 %v4298_v9, %v1924_v61  ;;  %v2002_v26 = vadd.f32 %v4298_v9, %v1929_v62  ;;  %v1974_v11 = vpop.permute.xlu1 %1973 }
 0x3ea   : > { %v2003_v38 = vadd.f32 %v4298_v9, %v1934_v2  ;;  %v2004_v44 = vadd.f32 %v4298_v9, %v1939_v1  ;;  %v2005_v53 = vadd.f32 %v4298_v9, %v1944_v7  ;;  %v2006_v61 = vadd.f32 %v4298_v9, %v1949_v3 }
 0x3eb   : > { %vm2023_vm0 = vcmp.gt.f32.partialorder %v2007_v16, 0.0  ;;  %v2039_v21 = vmul.f32 0.2, %v2007_v16  ;;  %vm2016_vm1 = vcmp.gt.f32.partialorder %v2000_v18, 0.0  ;;  %v2032_v23 = vmul.f32 0.2, %v2000_v18 }
 0x3ec   : > { %v2033_v24 = vmul.f32 0.2, %v2001_v19  ;;  %vm2017_vm2 = vcmp.gt.f32.partialorder %v2001_v19, 0.0  ;;  %v2034_v35 = vmul.f32 0.2, %v2002_v26  ;;  %vm2018_vm3 = vcmp.gt.f32.partialorder %v2002_v26, 0.0 }
 0x3ed   : > { %v2055_v27 = vsel %vm2023_vm0, %v2007_v16, %v2039_v21  ;;  %v2048_v30 = vsel %vm2016_vm1, %v2000_v18, %v2032_v23  ;;  %v2035_v43 = vmul.f32 0.2, %v2003_v38  ;;  %vm2019_vm4 = vcmp.gt.f32.partialorder %v2003_v38, 0.0  ;;  %v1979_v21 = vpop.permute.xlu1 %1978 }
 0x3ee   : > { %v4307_v28 = vadd.f32 %v3083_v55, %v2055_v27  ;;  %v4309_v32 = vadd.f32 %v3070_v22, %v2048_v30  ;;  %v2049_v34 = vsel %vm2017_vm2, %v2001_v19, %v2033_v24  ;;  %v2050_v42 = vsel %vm2018_vm3, %v2002_v26, %v2034_v35  ;;  %v3103_v19 = vld [vmem:[#allocation10 + $0x20] sm:$0xff]  }
 0x3ef   : > { %v4314_v39 = vadd.f32 %v3071_v33, %v2049_v34  ;;  %v4318_v46 = vadd.f32 %v3074_v40, %v2050_v42  ;;  %v2051_v48 = vsel %vm2019_vm4, %v2003_v38, %v2035_v43  ;;  %v2036_v50 = vmul.f32 0.2, %v2004_v44  ;;  %v3104_v34 = vld [vmem:[#allocation10 + $0x28] sm:$0xff]  }
 0x3f0   : > { %2126 = vmax.xlane.f32.xlu0 %v4307_v28  ;;  %2112 = vmax.xlane.f32.xlu1 %v4309_v32  ;;  %vm2020_vm5 = vcmp.gt.f32.partialorder %v2004_v44, 0.0  ;;  %v4322_v57 = vadd.f32 %v3075_v47, %v2051_v48  ;;  %v2037_v60 = vmul.f32 0.2, %v2005_v53  ;;  %vm2021_vm6 = vcmp.gt.f32.partialorder %v2005_v53, 0.0 }
 0x3f1   : > { %v2052_v59 = vsel %vm2020_vm5, %v2004_v44, %v2036_v50  ;;  %v3079_v1 = vunpack.c.h.bf16 %v3101_v52  ;;  %v2038_v8 = vmul.f32 0.2, %v2006_v61  ;;  %v2008_v7 = vadd.f32 %v4298_v9, %v1959_v31  ;;  %v1984_v36 = vpop.permute.xlu1 %1983 }
 0x3f2   : > { %v4326_v62 = vadd.f32 %v3078_v58, %v2052_v59  ;;  %v2053_v2 = vsel %vm2021_vm6, %v2005_v53, %v2037_v60  ;;  %vm2022_vm7 = vcmp.gt.f32.partialorder %v2006_v61, 0.0  ;;  %v3082_v16 = vunpack.c.l.bf16 %v4300_v10  ;;  %v3105_v53 = vld [vmem:[#allocation10 + $0x30] sm:$0xff]  }
 0x3f3   : > { %v4330_v14 = vadd.f32 %v3079_v1, %v2053_v2  ;;  %v2054_v18 = vsel %vm2022_vm7, %v2006_v61, %v2038_v8  ;;  %v2040_v3 = vmul.f32 0.2, %v2008_v7  ;;  %v2009_v55 = vadd.f32 %v4298_v9, %v1964_v45 }
 0x3f4   : > { %2114 = vmax.xlane.f32.xlu1 %v4314_v39  ;;  %vm2024_vm8 = vcmp.gt.f32.partialorder %v2008_v7, 0.0  ;;  %v4335_v22 = vadd.f32 %v3082_v16, %v2054_v18  ;;  %v3086_v23 = vunpack.c.l.bf16 %v3103_v19  ;;  %v2010_v27 = vadd.f32 %v4298_v9, %v1969_v56 }
 0x3f5   : > { %v2056_v24 = vsel %vm2024_vm8, %v2008_v7, %v2040_v3  ;;  %v2041_v26 = vmul.f32 0.2, %v2009_v55  ;;  %vm2025_vm9 = vcmp.gt.f32.partialorder %v2009_v55, 0.0  ;;  %v3087_v30 = vunpack.c.h.bf16 %v3103_v19  ;;  %v1989_v45 = vpop.permute.xlu1 %1988  ;;  %v3106_v3 = vld [vmem:[#allocation10 + $0x38] sm:$0xff]  }
 0x3f6   : > { %v4339_v10 = vadd.f32 %v3086_v23, %v2056_v24  ;;  %v2042_v33 = vmul.f32 0.2, %v2010_v27  ;;  %v2011_v35 = vadd.f32 %v4298_v9, %v1974_v11  ;;  %vm2026_vm10 = vcmp.gt.f32.partialorder %v2010_v27, 0.0 }
 0x3f7   : > { %v2057_v31 = vsel %vm2025_vm9, %v2009_v55, %v2041_v26  ;;  %v3090_v40 = vunpack.c.l.bf16 %v3104_v34  ;;  %v2012_v44 = vadd.f32 %v4298_v9, %v1979_v21  ;;  %v3091_v48 = vunpack.c.h.bf16 %v3104_v34 }
 0x3f8   : > { %2116 = vmax.xlane.f32.xlu1 %v4318_v46  ;;  %v4343_v38 = vadd.f32 %v3087_v30, %v2057_v31  ;;  %v2058_v42 = vsel %vm2026_vm10, %v2010_v27, %v2042_v33  ;;  %v2043_v43 = vmul.f32 0.2, %v2011_v35  ;;  %vm2027_vm11 = vcmp.gt.f32.partialorder %v2011_v35, 0.0 }
 0x3f9   : > { %v4347_v47 = vadd.f32 %v3090_v40, %v2058_v42  ;;  %v2044_v52 = vmul.f32 0.2, %v2012_v44  ;;  %v2013_v56 = vadd.f32 %v4298_v9, %v1984_v36  ;;  %vm2028_vm12 = vcmp.gt.f32.partialorder %v2012_v44, 0.0  ;;  %v1994_v2 = vpop.permute.xlu1 %1993 }
 0x3fa   : > { %v2059_v50 = vsel %vm2027_vm11, %v2011_v35, %v2043_v43  ;;  %v3094_v59 = vunpack.c.l.bf16 %v3105_v53  ;;  %v2014_v60 = vadd.f32 %v4298_v9, %v1989_v45  ;;  %v3095_v7 = vunpack.c.h.bf16 %v3105_v53 }
 0x3fb   : > { %v4351_v58 = vadd.f32 %v3091_v48, %v2059_v50  ;;  %v2060_v61 = vsel %vm2028_vm12, %v2012_v44, %v2044_v52  ;;  %v2045_v1 = vmul.f32 0.2, %v2013_v56  ;;  %vm2029_vm13 = vcmp.gt.f32.partialorder %v2013_v56, 0.0 }
 0x3fc   : > { %2118 = vmax.xlane.f32.xlu1 %v4322_v57  ;;  %v4355_v8 = vadd.f32 %v3094_v59, %v2060_v61  ;;  %v2046_v11 = vmul.f32 0.2, %v2014_v60  ;;  %v2015_v16 = vadd.f32 %v4298_v9, %v1994_v2  ;;  %vm2030_vm14 = vcmp.gt.f32.partialorder %v2014_v60, 0.0 }
 0x3fd   : > { %v2061_v18 = vsel %vm2029_vm13, %v2013_v56, %v2045_v1  ;;  %v3098_v55 = vunpack.c.l.bf16 %v3106_v3  ;;  %v3099_v26 = vunpack.c.h.bf16 %v3106_v3 }
 0x3fe   : > { %v4359_v19 = vadd.f32 %v3095_v7, %v2061_v18  ;;  %v2047_v21 = vmul.f32 0.2, %v2015_v16  ;;  %v2062_v23 = vsel %vm2030_vm14, %v2014_v60, %v2046_v11  ;;  %vm2031_vm15 = vcmp.gt.f32.partialorder %v2015_v16, 0.0 }
 0x3ff   : > { %v4362_v24 = vadd.f32 %v3098_v55, %v2062_v23 }
 0x400   : > { %2120 = vmax.xlane.f32.xlu1 %v4326_v62  ;;  %v2063_v27 = vsel %vm2031_vm15, %v2015_v16, %v2047_v21 }
 0x401   : > { %v4365_v9 = vadd.f32 %v3099_v26, %v2063_v27 }
 0x404   : > { %2122 = vmax.xlane.f32.xlu1 %v4330_v14 }
 0x408   : > { %2124 = vmax.xlane.f32.xlu1 %v4335_v22 }
 0x40c   : > { %2128 = vmax.xlane.f32.xlu1 %v4339_v10 }
 0x410   : > { %2130 = vmax.xlane.f32.xlu1 %v4343_v38 }
 0x414   : > { %2132 = vmax.xlane.f32.xlu1 %v4347_v47 }
 0x418   : > { %2134 = vmax.xlane.f32.xlu1 %v4351_v58 }
 0x41c   : > { %2136 = vmax.xlane.f32.xlu1 %v4355_v8 }
 0x420   : > { %2138 = vmax.xlane.f32.xlu1 %v4359_v19 }
 0x424   : > { %2140 = vmax.xlane.f32.xlu1 %v4362_v24 }
 0x428   : > { %2142 = vmax.xlane.f32.xlu1 %v4365_v9 }
 0x47d   : > { %v2113_v30 = vpop.xlane.xlu1 %2112  ;;  %v2127_v52 = vpop.xlane.xlu0 %2126 }
 0x47e   : > { %v2144_v31 = vsub.f32 %v4309_v32, %v2113_v30 }
 0x480   : > { %v2160_v33 = vmul.f32 1.442695, %v2144_v31 }
 0x481   : > { %v2115_v34 = vpop.xlane.xlu1 %2114 }
 0x482   : > { %3506 = vpow2.f32 %v2160_v33  ;;  %v2145_v35 = vsub.f32 %v4314_v39, %v2115_v34 }
 0x484   : > { %v2162_v36 = vmul.f32 1.442695, %v2145_v35 }
 0x485   : > { %v2117_v40 = vpop.xlane.xlu1 %2116 }
 0x486   : > { %3508 = vpow2.f32 %v2162_v36  ;;  %v2146_v42 = vsub.f32 %v4318_v46, %v2117_v40  ;;  %v2151_v46 = vsub.f32 %v4307_v28, %v2127_v52 }
 0x488   : > { %v2164_v43 = vmul.f32 1.442695, %v2146_v42  ;;  %v2174_v1 = vmul.f32 1.442695, %v2151_v46  ;;  %v3814_v42 = vmov 0  }
 0x489   : > { %v2119_v44 = vpop.xlane.xlu1 %2118  ;;  %2318 = vmatprep.mubr.bf16.mxu1 %v3814_v42 }
 0x48a   : > { %3510 = vpow2.f32 %v2164_v43  ;;  %v2147_v45 = vsub.f32 %v4322_v57, %v2119_v44 }
 0x48c   : > { %v4372_v48 = vpop.eup %3506  ;;  %v2166_v50 = vmul.f32 1.442695, %v2147_v45 }
 0x48d   : > { %2192 = vadd.xlane.f32.xlu1 %v4372_v48  ;;  %v2121_v32 = vpop.xlane.xlu1 %2120 }
 0x48e   : > { %3512 = vpow2.f32 %v2166_v50  ;;  %v2148_v39 = vsub.f32 %v4326_v62, %v2121_v32 }
 0x490   : > { %v4376_v53 = vpop.eup %3508  ;;  %v2168_v56 = vmul.f32 1.442695, %v2148_v39 }
 0x491   : > { %2194 = vadd.xlane.f32.xlu1 %v4376_v53  ;;  %v2123_v59 = vpop.xlane.xlu1 %2122 }
 0x492   : > { %3514 = vpow2.f32 %v2168_v56  ;;  %v2149_v57 = vsub.f32 %v4330_v14, %v2123_v59 }
 0x494   : > { %v4381_v60 = vpop.eup %3510  ;;  %v2170_v61 = vmul.f32 1.442695, %v2149_v57 }
 0x495   : > { %2196 = vadd.xlane.f32.xlu1 %v4381_v60  ;;  %v2125_v2 = vpop.xlane.xlu1 %2124 }
 0x496   : > { %3516 = vpow2.f32 %v2170_v61  ;;  %v2150_v62 = vsub.f32 %v4335_v22, %v2125_v2 }
 0x497   : > { %3518 = vpow2.f32 %v2174_v1 }
 0x498   : > { %v4385_v7 = vpop.eup %3512  ;;  %v2172_v11 = vmul.f32 1.442695, %v2150_v62 }
 0x499   : > { %2198 = vadd.xlane.f32.xlu0 %v4385_v7  ;;  %v2129_v28 = vpop.xlane.xlu1 %2128 }
 0x49a   : > { %3520 = vpow2.f32 %v2172_v11  ;;  %v2152_v14 = vsub.f32 %v4339_v10, %v2129_v28 }
 0x49c   : > { %v4389_v16 = vpop.eup %3514  ;;  %v2176_v18 = vmul.f32 1.442695, %v2152_v14 }
 0x49d   : > { %2200 = vadd.xlane.f32.xlu1 %v4389_v16  ;;  %v2131_v3 = vpop.xlane.xlu1 %2130 }
 0x49e   : > { %3522 = vpow2.f32 %v2176_v18  ;;  %v2153_v55 = vsub.f32 %v4343_v38, %v2131_v3 }
 0x4a0   : > { %v4393_v22 = vpop.eup %3516  ;;  %v2178_v21 = vmul.f32 1.442695, %v2153_v55 }
 0x4a1   : > { %2202 = vadd.xlane.f32.xlu0 %v4393_v22  ;;  %v2133_v23 = vpop.xlane.xlu1 %2132  ;;  %v4397_v27 = vpop.eup %3518 }
 0x4a2   : > { %3524 = vpow2.f32 %v2178_v21  ;;  %v2154_v26 = vsub.f32 %v4347_v47, %v2133_v23 }
 0x4a4   : > { %v4399_v10 = vpop.eup %3520  ;;  %v2180_v30 = vmul.f32 1.442695, %v2154_v26 }
 0x4a5   : > { %2206 = vadd.xlane.f32.xlu0 %v4397_v27  ;;  %2204 = vadd.xlane.f32.xlu1 %v4399_v10  ;;  %v2135_v31 = vpop.xlane.xlu1 %2134 }
 0x4a6   : > { %3526 = vpow2.f32 %v2180_v30  ;;  %v2155_v38 = vsub.f32 %v4351_v58, %v2135_v31 }
 0x4a8   : > { %v4404_v33 = vpop.eup %3522  ;;  %v2182_v34 = vmul.f32 1.442695, %v2155_v38 }
 0x4a9   : > { %2208 = vadd.xlane.f32.xlu1 %v4404_v33  ;;  %v2137_v35 = vpop.xlane.xlu1 %2136 }
 0x4aa   : > { %3528 = vpow2.f32 %v2182_v34  ;;  %v2156_v47 = vsub.f32 %v4355_v8, %v2137_v35 }
 0x4ac   : > { %v4408_v36 = vpop.eup %3524  ;;  %v2184_v40 = vmul.f32 1.442695, %v2156_v47 }
 0x4ad   : > { %2210 = vadd.xlane.f32.xlu0 %v4408_v36  ;;  %v2139_v43 = vpop.xlane.xlu1 %2138 }
 0x4ae   : > { %3530 = vpow2.f32 %v2184_v40  ;;  %v2157_v58 = vsub.f32 %v4359_v19, %v2139_v43 }
 0x4b0   : > { %v4413_v44 = vpop.eup %3526  ;;  %v2186_v45 = vmul.f32 1.442695, %v2157_v58 }
 0x4b1   : > { %2212 = vadd.xlane.f32.xlu1 %v4413_v44  ;;  %v2141_v50 = vpop.xlane.xlu1 %2140 }
 0x4b2   : > { %3532 = vpow2.f32 %v2186_v45  ;;  %v2158_v8 = vsub.f32 %v4362_v24, %v2141_v50 }
 0x4b4   : > { %v4417_v32 = vpop.eup %3528  ;;  %v2188_v52 = vmul.f32 1.442695, %v2158_v8 }
 0x4b5   : > { %2214 = vadd.xlane.f32.xlu0 %v4417_v32  ;;  %v2143_v39 = vpop.xlane.xlu1 %2142 }
 0x4b6   : > { %3534 = vpow2.f32 %v2188_v52  ;;  %v2159_v56 = vsub.f32 %v4365_v9, %v2143_v39 }
 0x4b8   : > { %v4421_v46 = vpop.eup %3530  ;;  %v2190_v19 = vmul.f32 1.442695, %v2159_v56 }
 0x4b9   : > { %2216 = vadd.xlane.f32.xlu1 %v4421_v46 }
 0x4ba   : > { %3536 = vpow2.f32 %v2190_v19  ;;  %v2272_v19 = vsub.s32 1, %v4231_v13 }
 0x4bc   : > { %v4424_v59 = vpop.eup %3532 }
 0x4bd   : > { %2218 = vadd.xlane.f32.xlu0 %v4424_v59 }
 0x4c0   : > { %v4427_v24 = vpop.eup %3534 }
 0x4c1   : > { %2220 = vadd.xlane.f32.xlu1 %v4427_v24 }
 0x4c4   : > { %v4430_v57 = vpop.eup %3536 }
 0x4c5   : > { %2222 = vadd.xlane.f32.xlu0 %v4430_v57 }
 0x51a   : > { %v2193_v61 = vpop.xlane.xlu1 %2192 }
 0x51b   : > { %3538 = vrcp.f32 %v2193_v61 }
 0x51e   : > { %v2195_v9 = vpop.xlane.xlu1 %2194 }
 0x51f   : > { %3540 = vrcp.f32 %v2195_v9 }
 0x522   : > { %v2197_v1 = vpop.xlane.xlu1 %2196 }
 0x523   : > { %3542 = vrcp.f32 %v2197_v1 }
 0x525   : > { %v3539_v62 = vpop.eup %3538 }
 0x526   : > { %v2199_v2 = vpop.xlane.xlu0 %2198  ;;  %v2240_v28 = vmul.f32 %v3539_v62, %v4372_v48 }
 0x527   : > { %3544 = vrcp.f32 %v2199_v2 }
 0x529   : > { %v3541_v11 = vpop.eup %3540 }
 0x52a   : > { %v2241_v14 = vmul.f32 %v3541_v11, %v4376_v53  ;;  %v2201_v18 = vpop.xlane.xlu1 %2200 }
 0x52b   : > { %3546 = vrcp.f32 %v2201_v18 }
 0x52c   : > { %v4435_v3 = vpack.c.bf16 %v2241_v14, %v2240_v28 }
 0x52d   : > { %v3543_v21 = vpop.eup %3542 }
 0x52e   : > { %v2203_v55 = vpop.xlane.xlu0 %2202  ;;  %2319 = vmatmul.mubr.bf16.vlgmr.msra.gmra.mrb[32].mxu1 %v4435_v3  ;;  %v2242_v53 = vmul.f32 %v3543_v21, %v4381_v60 }
 0x52f   : > { %3548 = vrcp.f32 %v2203_v55  ;;  %2400 = vmatpush1.bf16.msra.mxu1 %v4244_v51  ;;  %2328 = vmatprep.mubr.bf16.mxu1 %v3814_v42 }
 0x530   : > { %2401 = vmatprep.subr.bf16.mxu1 %v4252_v4 }
 0x531   : > { %v3545_v23 = vpop.eup %3544 }
 0x532   : > { %v2207_v26 = vpop.xlane.xlu0 %2206  ;;  %v2205_v48 = vpop.xlane.xlu1 %2204  ;;  %v2243_v30 = vmul.f32 %v3545_v23, %v4385_v7 }
 0x533   : > { %3550 = vrcp.f32 %v2207_v26  ;;  %2402 = vmatpush1.bf16.msra.mxu1 %v4250_v0 }
 0x534   : > { %3552 = vrcp.f32 %v2205_v48  ;;  %2403 = vmatprep.subr.bf16.mxu1 %v4256_v17  ;;  %v4445_v31 = vpack.c.bf16 %v2243_v30, %v2242_v53 }
 0x535   : > { %v3547_v51 = vpop.eup %3546 }
 0x536   : > { %2329 = vmatmul.mubr.bf16.gmra.mrb[36].mxu1 %v4445_v31  ;;  %v2209_v60 = vpop.xlane.xlu1 %2208  ;;  %v2244_v38 = vmul.f32 %v3547_v51, %v4389_v16 }
 0x537   : > { %2404 = vmatpush1.bf16.msra.mxu1 %v4254_v12  ;;  %2338 = vmatprep.mubr.bf16.mxu1 %v3814_v42 }
 0x538   : > { %2405 = vmatprep.subr.bf16.mxu1 %v4260_v29 }
 0x539   : > { %v3549_v4 = vpop.eup %3548 }
 0x53a   : > { %v2211_v7 = vpop.xlane.xlu0 %2210  ;;  %v2245_v0 = vmul.f32 %v3549_v4, %v4393_v22 }
 0x53b   : > { %3554 = vrcp.f32 %v2211_v7  ;;  %2406 = vmatpush1.bf16.msra.mxu1 %v4258_v25 }
 0x53c   : > { %2407 = vmatprep.subr.bf16.mxu1 %v4264_v41  ;;  %v2258_v17 = vpack.c.bf16 %v2245_v0, %v2244_v38  ;;  %3556 = vrcp.f32 %v2209_v60 }
 0x53d   : > { %v3551_v34 = vpop.eup %3550 }
 0x53e   : > { %v3553_v12 = vpop.eup %3552  ;;  %2339 = vmatmul.mubr.bf16.gmra.mrb[40].mxu1 %v2258_v17  ;;  %v2247_v16 = vmul.f32 %v3551_v34, %v4397_v27  ;;  %v2213_v22 = vpop.xlane.xlu1 %2212 }
 0x53f   : > { %2408 = vmatpush1.bf16.msra.mxu1 %v4262_v37  ;;  %2348 = vmatprep.mubr.bf16.mxu1 %v3814_v42  ;;  %v2246_v29 = vmul.f32 %v3553_v12, %v4399_v10 }
 0x540   : > { %2409 = vmatprep.subr.bf16.mxu1 %v4268_v54 }
 0x541   : > { %v2259_v25 = vpack.c.bf16 %v2247_v16, %v2246_v29 }
 0x542   : > { %v2215_v35 = vpop.xlane.xlu0 %2214 }
 0x543   : > { %3558 = vrcp.f32 %v2215_v35  ;;  %2410 = vmatpush1.bf16.msra.mxu1 %v4266_v49 }
 0x544   : > { %2411 = vmatprep.subr.bf16.mxu1 %v4272_v5  ;;  %3560 = vrcp.f32 %v2213_v22 }
 0x545   : > { %v3555_v41 = vpop.eup %3554 }
 0x546   : > { %2349 = vmatmul.mubr.bf16.gmra.mrb[44].mxu1 %v2259_v25  ;;  %v3557_v37 = vpop.eup %3556  ;;  %v2249_v54 = vmul.f32 %v3555_v41, %v4408_v36  ;;  %v2217_v27 = vpop.xlane.xlu1 %2216 }
 0x547   : > { %2412 = vmatpush1.bf16.msra.mxu1 %v4270_v63  ;;  %2358 = vmatprep.mubr.bf16.mxu1 %v3814_v42  ;;  %v2248_v47 = vmul.f32 %v3557_v37, %v4404_v33 }
 0x548   : > { %2413 = vmatprep.subr.bf16.mxu1 %v4276_v20 }
 0x549   : > { %v2260_v49 = vpack.c.bf16 %v2249_v54, %v2248_v47 }
 0x54a   : > { %v2219_v10 = vpop.xlane.xlu0 %2218 }
 0x54b   : > { %3562 = vrcp.f32 %v2219_v10  ;;  %2414 = vmatpush1.bf16.msra.mxu1 %v4274_v15 }
 0x54c   : > { %3564 = vrcp.f32 %v2217_v27 }
 0x54d   : > { %v3559_v5 = vpop.eup %3558 }
 0x54e   : > { %2359 = vmatmul.mubr.bf16.gmra.mrb[48].mxu1 %v2260_v49  ;;  %v3561_v40 = vpop.eup %3560  ;;  %v2251_v63 = vmul.f32 %v3559_v5, %v4417_v32  ;;  %v2221_v43 = vpop.xlane.xlu1 %2220 }
 0x54f   : > { %2368 = vmatprep.mubr.bf16.mxu1 %v3814_v42  ;;  %v2250_v36 = vmul.f32 %v3561_v40, %v4413_v44 }
 0x551   : > { %v2261_v58 = vpack.c.bf16 %v2251_v63, %v2250_v36 }
 0x552   : > { %v2223_v20 = vpop.xlane.xlu0 %2222 }
 0x553   : > { %3566 = vrcp.f32 %v2223_v20 }
 0x554   : > { %3568 = vrcp.f32 %v2221_v43 }
 0x555   : > { %v3563_v45 = vpop.eup %3562 }
 0x556   : > { %2369 = vmatmul.mubr.bf16.gmra.mrb[52].mxu1 %v2261_v58  ;;  %v3565_v33 = vpop.eup %3564  ;;  %v2253_v15 = vmul.f32 %v3563_v45, %v4424_v59 }
 0x557   : > { %2378 = vmatprep.mubr.bf16.mxu1 %v3814_v42  ;;  %v2252_v50 = vmul.f32 %v3565_v33, %v4421_v46  ;;  %v4488_v46 = vld [vmem:[%s4074_s27] sm:$0xf] }
 0x558   : > { %v4494_v59 = vrot.slane %v4488_v46, %v1998_v6 }
 0x559   : > { %v2262_v8 = vpack.c.bf16 %v2253_v15, %v2252_v50 }
 0x55d   : > { %v3567_v52 = vpop.eup %3566 }
 0x55e   : > { %2379 = vmatmul.mubr.bf16.gmra.mrb[56].mxu1 %v2262_v8  ;;  %v3569_v32 = vpop.eup %3568  ;;  %v2255_v44 = vmul.f32 %v3567_v52, %v4430_v57 }
 0x55f   : > { %2388 = vmatprep.mubr.bf16.mxu1 %v3814_v42  ;;  %v2254_v39 = vmul.f32 %v3569_v32, %v4427_v24  ;;  %v4497_v24 = vrot.slane %v4488_v46, %v2272_v19 }
 0x561   : > { %v2263_v56 = vpack.c.bf16 %v2255_v44, %v2254_v39 }
 0x566   : > { %2389 = vmatmul.mubr.bf16.gmra.mrb[60].mxu1 %v2263_v56 }
 0x567   : > { %2431 = vmatprep.mubr.bf16.mxu1 %v3814_v42 }
 0x56e   : > { %2432 = vmatmul.mubr.bf16.vlgmr.msra.gmra.mrb[64].mxu1 %v4435_v3 }
 0x56f   : > { %2441 = vmatprep.mubr.bf16.mxu1 %v3814_v42 }
 0x576   : > { %2442 = vmatmul.mubr.bf16.gmra.mrb[68].mxu1 %v4445_v31 }
 0x577   : > { %2451 = vmatprep.mubr.bf16.mxu1 %v3814_v42 }
 0x57e   : > { %2452 = vmatmul.mubr.bf16.gmra.mrb[72].mxu1 %v2258_v17 }
 0x57f   : > { %2461 = vmatprep.mubr.bf16.mxu1 %v3814_v42 }
 0x586   : > { %2462 = vmatmul.mubr.bf16.gmra.mrb[76].mxu1 %v2259_v25 }
 0x587   : > { %2471 = vmatprep.mubr.bf16.mxu1 %v3814_v42 }
 0x58e   : > { %2472 = vmatmul.mubr.bf16.gmra.mrb[80].mxu1 %v2260_v49 }
 0x58f   : > { %2481 = vmatprep.mubr.bf16.mxu1 %v3814_v42 }
 0x596   : > { %2482 = vmatmul.mubr.bf16.gmra.mrb[84].mxu1 %v2261_v58 }
 0x597   : > { %2491 = vmatprep.mubr.bf16.mxu1 %v3814_v42 }
 0x59e   : > { %2492 = vmatmul.mubr.bf16.gmra.mrb[88].mxu1 %v2262_v8 }
 0x59f   : > { %2501 = vmatprep.mubr.bf16.mxu1 %v3814_v42 }
 0x5a6   : > { %2502 = vmatmul.mubr.bf16.gmra.mrb[92].mxu1 %v2263_v56 }
 0x601   : > { %v2320_v57 = vpop.f32.mrb[32].mxu1 }
 0x602   : > { %v2321_v61 = vadd.f32 %v2320_v57, %v4494_v59  ;;  %v2322_v9 = vpop.f32.mrb[33].mxu1 }
 0x603   : > { %v2323_v1 = vadd.f32 %v2322_v9, %v4497_v24  ;;  %v2324_v42 = vpop.f32.mrb[34].mxu1 }
 0x604   : > { %v2325_v2 = vadd.f32 %v2324_v42, %v4494_v59  ;;  %v2326_v62 = vpop.f32.mrb[35].mxu1  ;;  %v2512_v28 = vmax.f32 %v2321_v61, 0.0 }
 0x605   : > { %v2327_v11 = vadd.f32 %v2326_v62, %v4497_v24  ;;  %v2513_v18 = vmax.f32 %v2323_v1, 0.0 }
 0x606   : > { %v2516_v14 = vmax.f32 %v2325_v2, 0.0 }
 0x607   : > { %v2517_v6 = vmax.f32 %v2327_v11, 0.0 }
 0x608   : > { %v2576_v3 = vpack.c.bf16 %v2516_v14, %v2512_v28 }
 0x609   : > { %v2577_v55 = vpack.c.bf16 %v2517_v6, %v2513_v18  ;;  %v2330_v21 = vpop.f32.mrb[36].mxu1 }
 0x60a   : > { %2608 = vst [vmem:[#allocation2] sm:$0xff] %v2576_v3  ;;  %v2331_v23 = vadd.f32 %v2330_v21, %v4494_v59  ;;  %v2332_v26 = vpop.f32.mrb[37].mxu1 }
 0x60b   : > { %2609 = vst [vmem:[#allocation2 + $0x8] sm:$0xff] %v2577_v55  ;;  %v2333_v48 = vadd.f32 %v2332_v26, %v4497_v24  ;;  %v2334_v53 = vpop.f32.mrb[38].mxu1 }
 0x60c   : > { %v2335_v30 = vadd.f32 %v2334_v53, %v4494_v59  ;;  %v2336_v31 = vpop.f32.mrb[39].mxu1  ;;  %v2520_v4 = vmax.f32 %v2331_v23, 0.0 }
 0x60d   : > { %v2337_v51 = vadd.f32 %v2336_v31, %v4497_v24  ;;  %v2521_v7 = vmax.f32 %v2333_v48, 0.0 }
 0x60e   : > { %v2524_v60 = vmax.f32 %v2335_v30, 0.0 }
 0x60f   : > { %v2525_v38 = vmax.f32 %v2337_v51, 0.0 }
 0x610   : > { %v2580_v0 = vpack.c.bf16 %v2524_v60, %v2520_v4 }
 0x611   : > { %v2581_v17 = vpack.c.bf16 %v2525_v38, %v2521_v7  ;;  %v2340_v34 = vpop.f32.mrb[40].mxu1 }
 0x612   : > { %2612 = vst [vmem:[#allocation2 + $0x20] sm:$0xff] %v2580_v0  ;;  %v2341_v12 = vadd.f32 %v2340_v34, %v4494_v59  ;;  %v2342_v29 = vpop.f32.mrb[41].mxu1 }
 0x613   : > { %2613 = vst [vmem:[#allocation2 + $0x28] sm:$0xff] %v2581_v17  ;;  %v2343_v16 = vadd.f32 %v2342_v29, %v4497_v24  ;;  %v2344_v22 = vpop.f32.mrb[42].mxu1 }
 0x614   : > { %v2345_v35 = vadd.f32 %v2344_v22, %v4494_v59  ;;  %v2346_v25 = vpop.f32.mrb[43].mxu1  ;;  %v2528_v37 = vmax.f32 %v2341_v12, 0.0 }
 0x615   : > { %v2347_v41 = vadd.f32 %v2346_v25, %v4497_v24  ;;  %v2529_v27 = vmax.f32 %v2343_v16, 0.0 }
 0x616   : > { %v2532_v54 = vmax.f32 %v2345_v35, 0.0 }
 0x617   : > { %v2533_v10 = vmax.f32 %v2347_v41, 0.0 }
 0x618   : > { %v2584_v47 = vpack.c.bf16 %v2532_v54, %v2528_v37 }
 0x619   : > { %v2585_v49 = vpack.c.bf16 %v2533_v10, %v2529_v27  ;;  %v2350_v5 = vpop.f32.mrb[44].mxu1 }
 0x61a   : > { %2616 = vst [vmem:[#allocation2 + $0x40] sm:$0xff] %v2584_v47  ;;  %v2351_v40 = vadd.f32 %v2350_v5, %v4494_v59  ;;  %v2352_v63 = vpop.f32.mrb[45].mxu1 }
 0x61b   : > { %2617 = vst [vmem:[#allocation2 + $0x48] sm:$0xff] %v2585_v49  ;;  %v2353_v43 = vadd.f32 %v2352_v63, %v4497_v24  ;;  %v2354_v20 = vpop.f32.mrb[46].mxu1  ;;  %v2276_v49 = vsub.s32 2, %v4231_v13  ;;  %v2280_v63 = vsub.s32 3, %v4231_v13 }
 0x61c   : > { %v2355_v36 = vadd.f32 %v2354_v20, %v4494_v59  ;;  %v2356_v58 = vpop.f32.mrb[47].mxu1  ;;  %v2536_v33 = vmax.f32 %v2351_v40, 0.0 }
 0x61d   : > { %v2357_v45 = vadd.f32 %v2356_v58, %v4497_v24  ;;  %v2537_v50 = vmax.f32 %v2353_v43, 0.0 }
 0x61e   : > { %v2540_v15 = vmax.f32 %v2355_v36, 0.0 }
 0x61f   : > { %v2541_v8 = vmax.f32 %v2357_v45, 0.0 }
 0x620   : > { %v2588_v52 = vpack.c.bf16 %v2540_v15, %v2536_v33  ;;  %v4534_v33 = vrot.slane %v4488_v46, %v2276_v49 }
 0x621   : > { %v2589_v32 = vpack.c.bf16 %v2541_v8, %v2537_v50  ;;  %v2360_v44 = vpop.f32.mrb[48].mxu1  ;;  %v4537_v8 = vrot.slane %v4488_v46, %v2280_v63 }
 0x622   : > { %2620 = vst [vmem:[#allocation2 + $0x60] sm:$0xff] %v2588_v52  ;;  %v2361_v39 = vadd.f32 %v2360_v44, %v4494_v59  ;;  %v2362_v56 = vpop.f32.mrb[49].mxu1 }
 0x623   : > { %2621 = vst [vmem:[#allocation2 + $0x68] sm:$0xff] %v2589_v32  ;;  %v2363_v19 = vadd.f32 %v2362_v56, %v4497_v24  ;;  %v2364_v57 = vpop.f32.mrb[50].mxu1 }
 0x624   : > { %v2365_v61 = vadd.f32 %v2364_v57, %v4494_v59  ;;  %v2366_v9 = vpop.f32.mrb[51].mxu1  ;;  %v2544_v42 = vmax.f32 %v2361_v39, 0.0 }
 0x625   : > { %v2367_v1 = vadd.f32 %v2366_v9, %v4497_v24  ;;  %v2545_v62 = vmax.f32 %v2363_v19, 0.0 }
 0x626   : > { %v2548_v2 = vmax.f32 %v2365_v61, 0.0 }
 0x627   : > { %v2549_v11 = vmax.f32 %v2367_v1, 0.0 }
 0x628   : > { %v2592_v28 = vpack.c.bf16 %v2548_v2, %v2544_v42 }
 0x629   : > { %v2593_v14 = vpack.c.bf16 %v2549_v11, %v2545_v62  ;;  %v2370_v18 = vpop.f32.mrb[52].mxu1 }
 0x62a   : > { %2624 = vst [vmem:[#allocation2 + $0x80] sm:$0xff] %v2592_v28  ;;  %v2371_v6 = vadd.f32 %v2370_v18, %v4494_v59  ;;  %v2372_v3 = vpop.f32.mrb[53].mxu1 }
 0x62b   : > { %2625 = vst [vmem:[#allocation2 + $0x88] sm:$0xff] %v2593_v14  ;;  %v2373_v55 = vadd.f32 %v2372_v3, %v4497_v24  ;;  %v2374_v21 = vpop.f32.mrb[54].mxu1 }
 0x62c   : > { %v2375_v23 = vadd.f32 %v2374_v21, %v4494_v59  ;;  %v2376_v26 = vpop.f32.mrb[55].mxu1  ;;  %v2552_v53 = vmax.f32 %v2371_v6, 0.0 }
 0x62d   : > { %v2377_v48 = vadd.f32 %v2376_v26, %v4497_v24  ;;  %v2553_v31 = vmax.f32 %v2373_v55, 0.0 }
 0x62e   : > { %v2556_v30 = vmax.f32 %v2375_v23, 0.0 }
 0x62f   : > { %v2557_v51 = vmax.f32 %v2377_v48, 0.0 }
 0x630   : > { %v2596_v4 = vpack.c.bf16 %v2556_v30, %v2552_v53 }
 0x631   : > { %v2597_v60 = vpack.c.bf16 %v2557_v51, %v2553_v31  ;;  %v2380_v7 = vpop.f32.mrb[56].mxu1 }
 0x632   : > { %2628 = vst [vmem:[#allocation2 + $0xa0] sm:$0xff] %v2596_v4  ;;  %v2381_v38 = vadd.f32 %v2380_v7, %v4494_v59  ;;  %v2382_v0 = vpop.f32.mrb[57].mxu1 }
 0x633   : > { %2629 = vst [vmem:[#allocation2 + $0xa8] sm:$0xff] %v2597_v60  ;;  %v2383_v17 = vadd.f32 %v2382_v0, %v4497_v24  ;;  %v2384_v34 = vpop.f32.mrb[58].mxu1 }
 0x634   : > { %v2385_v12 = vadd.f32 %v2384_v34, %v4494_v59  ;;  %v2386_v29 = vpop.f32.mrb[59].mxu1  ;;  %v2560_v22 = vmax.f32 %v2381_v38, 0.0 }
 0x635   : > { %v2387_v16 = vadd.f32 %v2386_v29, %v4497_v24  ;;  %v2561_v25 = vmax.f32 %v2383_v17, 0.0 }
 0x636   : > { %v2564_v35 = vmax.f32 %v2385_v12, 0.0 }
 0x637   : > { %v2565_v41 = vmax.f32 %v2387_v16, 0.0 }
 0x638   : > { %v2600_v37 = vpack.c.bf16 %v2564_v35, %v2560_v22 }
 0x639   : > { %v2601_v54 = vpack.c.bf16 %v2565_v41, %v2561_v25  ;;  %v2390_v27 = vpop.f32.mrb[60].mxu1 }
 0x63a   : > { %2632 = vst [vmem:[#allocation2 + $0xc0] sm:$0xff] %v2600_v37  ;;  %v2391_v10 = vadd.f32 %v2390_v27, %v4494_v59  ;;  %v2392_v47 = vpop.f32.mrb[61].mxu1 }
 0x63b   : > { %2633 = vst [vmem:[#allocation2 + $0xc8] sm:$0xff] %v2601_v54  ;;  %v2393_v5 = vadd.f32 %v2392_v47, %v4497_v24  ;;  %v2394_v40 = vpop.f32.mrb[62].mxu1 }
 0x63c   : > { %v2395_v43 = vadd.f32 %v2394_v40, %v4494_v59  ;;  %v2396_v20 = vpop.f32.mrb[63].mxu1  ;;  %v2568_v58 = vmax.f32 %v2391_v10, 0.0 }
 0x63d   : > { %v2397_v36 = vadd.f32 %v2396_v20, %v4497_v24  ;;  %v2569_v15 = vmax.f32 %v2393_v5, 0.0 }
 0x63e   : > { %v2572_v45 = vmax.f32 %v2395_v43, 0.0 }
 0x63f   : > { %v2573_v50 = vmax.f32 %v2397_v36, 0.0 }
 0x640   : > { %v2604_v52 = vpack.c.bf16 %v2572_v45, %v2568_v58 }
 0x641   : > { %v2605_v32 = vpack.c.bf16 %v2573_v50, %v2569_v15  ;;  %v2433_v44 = vpop.f32.mrb[64].mxu1 }
 0x642   : > { %2636 = vst [vmem:[#allocation2 + $0xe0] sm:$0xff] %v2604_v52  ;;  %v2434_v39 = vadd.f32 %v2433_v44, %v4534_v33  ;;  %v2435_v59 = vpop.f32.mrb[65].mxu1 }
 0x643   : > { %2637 = vst [vmem:[#allocation2 + $0xe8] sm:$0xff] %v2605_v32  ;;  %v2436_v24 = vadd.f32 %v2435_v59, %v4537_v8  ;;  %v2437_v56 = vpop.f32.mrb[66].mxu1 }
 0x644   : > { %v2438_v19 = vadd.f32 %v2437_v56, %v4534_v33  ;;  %v2439_v57 = vpop.f32.mrb[67].mxu1  ;;  %v2514_v9 = vmax.f32 %v2434_v39, 0.0 }
 0x645   : > { %v2440_v61 = vadd.f32 %v2439_v57, %v4537_v8  ;;  %v2515_v46 = vmax.f32 %v2436_v24, 0.0 }
 0x646   : > { %v2518_v1 = vmax.f32 %v2438_v19, 0.0 }
 0x647   : > { %v2519_v42 = vmax.f32 %v2440_v61, 0.0 }
 0x648   : > { %v2578_v2 = vpack.c.bf16 %v2518_v1, %v2514_v9 }
 0x649   : > { %v2579_v62 = vpack.c.bf16 %v2519_v42, %v2515_v46  ;;  %v2443_v11 = vpop.f32.mrb[68].mxu1 }
 0x64a   : > { %2610 = vst [vmem:[#allocation2 + $0x10] sm:$0xff] %v2578_v2  ;;  %v2444_v28 = vadd.f32 %v2443_v11, %v4534_v33  ;;  %v2445_v14 = vpop.f32.mrb[69].mxu1 }
 0x64b   : > { %2611 = vst [vmem:[#allocation2 + $0x18] sm:$0xff] %v2579_v62  ;;  %v2446_v18 = vadd.f32 %v2445_v14, %v4537_v8  ;;  %v2447_v6 = vpop.f32.mrb[70].mxu1 }
 0x64c   : > { %v2448_v3 = vadd.f32 %v2447_v6, %v4534_v33  ;;  %v2449_v55 = vpop.f32.mrb[71].mxu1  ;;  %v2522_v23 = vmax.f32 %v2444_v28, 0.0 }
 0x64d   : > { %v2450_v21 = vadd.f32 %v2449_v55, %v4537_v8  ;;  %v2523_v48 = vmax.f32 %v2446_v18, 0.0 }
 0x64e   : > { %v2526_v26 = vmax.f32 %v2448_v3, 0.0 }
 0x64f   : > { %v2527_v53 = vmax.f32 %v2450_v21, 0.0 }
 0x650   : > { %v2582_v30 = vpack.c.bf16 %v2526_v26, %v2522_v23 }
 0x651   : > { %v2583_v31 = vpack.c.bf16 %v2527_v53, %v2523_v48  ;;  %v2453_v51 = vpop.f32.mrb[72].mxu1 }
 0x652   : > { %2614 = vst [vmem:[#allocation2 + $0x30] sm:$0xff] %v2582_v30  ;;  %v2454_v4 = vadd.f32 %v2453_v51, %v4534_v33  ;;  %v2455_v60 = vpop.f32.mrb[73].mxu1 }
 0x653   : > { %2615 = vst [vmem:[#allocation2 + $0x38] sm:$0xff] %v2583_v31  ;;  %v2456_v7 = vadd.f32 %v2455_v60, %v4537_v8  ;;  %v2457_v38 = vpop.f32.mrb[74].mxu1 }
 0x654   : > { %v2458_v0 = vadd.f32 %v2457_v38, %v4534_v33  ;;  %v2459_v17 = vpop.f32.mrb[75].mxu1  ;;  %v2530_v12 = vmax.f32 %v2454_v4, 0.0 }
 0x655   : > { %v2460_v34 = vadd.f32 %v2459_v17, %v4537_v8  ;;  %v2531_v16 = vmax.f32 %v2456_v7, 0.0 }
 0x656   : > { %v2534_v29 = vmax.f32 %v2458_v0, 0.0 }
 0x657   : > { %v2535_v22 = vmax.f32 %v2460_v34, 0.0 }
 0x658   : > { %v2586_v35 = vpack.c.bf16 %v2534_v29, %v2530_v12 }
 0x659   : > { %v2587_v25 = vpack.c.bf16 %v2535_v22, %v2531_v16  ;;  %v2463_v41 = vpop.f32.mrb[76].mxu1 }
 0x65a   : > { %2618 = vst [vmem:[#allocation2 + $0x50] sm:$0xff] %v2586_v35  ;;  %v2464_v37 = vadd.f32 %v2463_v41, %v4534_v33  ;;  %v2465_v54 = vpop.f32.mrb[77].mxu1 }
 0x65b   : > { %2619 = vst [vmem:[#allocation2 + $0x58] sm:$0xff] %v2587_v25  ;;  %v2466_v27 = vadd.f32 %v2465_v54, %v4537_v8  ;;  %v2467_v10 = vpop.f32.mrb[78].mxu1 }
 0x65c   : > { %v2468_v47 = vadd.f32 %v2467_v10, %v4534_v33  ;;  %v2469_v49 = vpop.f32.mrb[79].mxu1  ;;  %v2538_v40 = vmax.f32 %v2464_v37, 0.0 }
 0x65d   : > { %v2470_v5 = vadd.f32 %v2469_v49, %v4537_v8  ;;  %v2539_v43 = vmax.f32 %v2466_v27, 0.0 }
 0x65e   : > { %v2542_v63 = vmax.f32 %v2468_v47, 0.0 }
 0x65f   : > { %v2543_v20 = vmax.f32 %v2470_v5, 0.0 }
 0x660   : > { %v2590_v36 = vpack.c.bf16 %v2542_v63, %v2538_v40  ;;  %v2646_v63 = vld [vmem:[#allocation2 + $0x8] sm:$0xff] (!%p3059_p0) }
 0x661   : > { %v2591_v58 = vpack.c.bf16 %v2543_v20, %v2539_v43  ;;  %v2473_v45 = vpop.f32.mrb[80].mxu1  ;;  %v2648_v43 = vld [vmem:[#allocation2 + $0x18] sm:$0xff] (!%p3059_p0)  ;;  %v2645_v20 = vld [vmem:[#allocation2] sm:$0xff] (!%p3059_p0)  ;;  %2677 = vmatprep.subr.bf16.mxu0 (!%p3059_p0), %v2646_v63 }
 0x662   : > { %2622 = vst [vmem:[#allocation2 + $0x70] sm:$0xff] %v2590_v36  ;;  %v2474_v15 = vadd.f32 %v2473_v45, %v4534_v33  ;;  %v2475_v50 = vpop.f32.mrb[81].mxu1  ;;  %2718 = vmatprep.subr.bf16.mxu1 (!%p3059_p0), %v2648_v43  ;;  %v2650_v36 = vld [vmem:[#allocation2 + $0x28] sm:$0xff] (!%p3059_p0)  ;;  %2678 = vmatpush1.bf16.msra.mxu0 (!%p3059_p0), %v2645_v20  ;;  %v2651_v45 = vld [vmem:[#allocation2 + $0x30] sm:$0xff] (!%p3059_p0) }
 0x663   : > { %2623 = vst [vmem:[#allocation2 + $0x78] sm:$0xff] %v2591_v58  ;;  %v2476_v52 = vadd.f32 %v2475_v50, %v4537_v8  ;;  %v2477_v32 = vpop.f32.mrb[82].mxu1  ;;  %v2652_v58 = vld [vmem:[#allocation2 + $0x38] sm:$0xff] (!%p3059_p0)  ;;  %2679 = vmatprep.subr.bf16.mxu0 (!%p3059_p0), %v2650_v36 }
 0x664   : > { %v2478_v44 = vadd.f32 %v2477_v32, %v4534_v33  ;;  %v2479_v39 = vpop.f32.mrb[83].mxu1  ;;  %v2546_v24 = vmax.f32 %v2474_v15, 0.0  ;;  %v2654_v15 = vld [vmem:[#allocation2 + $0x48] sm:$0xff] (!%p3059_p0)  ;;  %v2656_v50 = vld [vmem:[#allocation2 + $0x58] sm:$0xff] (!%p3059_p0)  ;;  %v2653_v32 = vld [vmem:[#allocation2 + $0x40] sm:$0xff] (!%p3059_p0) }
 0x665   : > { %v2480_v59 = vadd.f32 %v2479_v39, %v4537_v8  ;;  %v2547_v19 = vmax.f32 %v2476_v52, 0.0  ;;  %v3815_v52 = vmov (!%p3059_p0), 0   ;;  %v2658_v39 = vld [vmem:[#allocation2 + $0x68] sm:$0xff] (!%p3059_p0) }
 0x666   : > { %v2550_v56 = vmax.f32 %v2478_v44, 0.0  ;;  %2709 = vmatprep.mubr.bf16.mxu0 (!%p3059_p0), %v3815_v52  ;;  %2750 = vmatprep.mubr.bf16.mxu1 (!%p3059_p0), %v3815_v52  ;;  %v2655_v44 = vld [vmem:[#allocation2 + $0x50] sm:$0xff] (!%p3059_p0) }
 0x667   : > { %v2551_v57 = vmax.f32 %v2480_v59, 0.0 }
 0x668   : > { %v2594_v61 = vpack.c.bf16 %v2550_v56, %v2546_v24  ;;  %v2657_v24 = vld [vmem:[#allocation2 + $0x60] sm:$0xff] (!%p3059_p0) }
 0x669   : > { %v2595_v9 = vpack.c.bf16 %v2551_v57, %v2547_v19  ;;  %v2483_v1 = vpop.f32.mrb[84].mxu1  ;;  %v2659_v56 = vld [vmem:[#allocation2 + $0x70] sm:$0xff] (!%p3059_p0)  ;;  %v2662_v19 = vld [vmem:[#allocation2 + $0x88] sm:$0xff] (!%p3059_p0) }
 0x66a   : > { %2626 = vst [vmem:[#allocation2 + $0x90] sm:$0xff] %v2594_v61  ;;  %v2484_v46 = vadd.f32 %v2483_v1, %v4534_v33  ;;  %v2485_v42 = vpop.f32.mrb[85].mxu1  ;;  %v2660_v59 = vld [vmem:[#allocation2 + $0x78] sm:$0xff] (!%p3059_p0)  ;;  %v2661_v61 = vld [vmem:[#allocation2 + $0x80] sm:$0xff] (!%p3059_p0)  ;;  %v2666_v1 = vld [vmem:[#allocation2 + $0xa8] sm:$0xff] (!%p3059_p0) }
 0x66b   : > { %2627 = vst [vmem:[#allocation2 + $0x98] sm:$0xff] %v2595_v9  ;;  %v2486_v2 = vadd.f32 %v2485_v42, %v4537_v8  ;;  %v2487_v62 = vpop.f32.mrb[86].mxu1  ;;  %v2665_v42 = vld [vmem:[#allocation2 + $0xa0] sm:$0xff] (!%p3059_p0) }
 0x66c   : > { %v2488_v11 = vadd.f32 %v2487_v62, %v4534_v33  ;;  %v2489_v28 = vpop.f32.mrb[87].mxu1  ;;  %v2554_v18 = vmax.f32 %v2484_v46, 0.0  ;;  %v2670_v62 = vld [vmem:[#allocation2 + $0xc8] sm:$0xff] (!%p3059_p0) }
 0x66d   : > { %v2490_v14 = vadd.f32 %v2489_v28, %v4537_v8  ;;  %v2555_v3 = vmax.f32 %v2486_v2, 0.0  ;;  %v2669_v28 = vld [vmem:[#allocation2 + $0xc0] sm:$0xff] (!%p3059_p0) }
 0x66e   : > { %v2558_v6 = vmax.f32 %v2488_v11, 0.0 }
 0x66f   : > { %v2559_v55 = vmax.f32 %v2490_v14, 0.0 }
 0x670   : > { %v2598_v21 = vpack.c.bf16 %v2558_v6, %v2554_v18  ;;  %v2674_v18 = vld [vmem:[#allocation2 + $0xe8] sm:$0xff] (!%p3059_p0) }
 0x671   : > { %v2599_v23 = vpack.c.bf16 %v2559_v55, %v2555_v3  ;;  %v2493_v26 = vpop.f32.mrb[88].mxu1  ;;  %v2663_v9 = vld [vmem:[#allocation2 + $0x90] sm:$0xff] (!%p3059_p0)  ;;  %v2673_v3 = vld [vmem:[#allocation2 + $0xe0] sm:$0xff] (!%p3059_p0) }
 0x672   : > { %2630 = vst [vmem:[#allocation2 + $0xb0] sm:$0xff] %v2598_v21  ;;  %v2494_v48 = vadd.f32 %v2493_v26, %v4534_v33  ;;  %v2495_v53 = vpop.f32.mrb[89].mxu1  ;;  %v2664_v57 = vld [vmem:[#allocation2 + $0x98] sm:$0xff] (!%p3059_p0)  ;;  %v2644_v21 = vld [vmem:[#allocation12] sm:$0x1] (!%p3059_p0) }
 0x673   : > { %2631 = vst [vmem:[#allocation2 + $0xb8] sm:$0xff] %v2599_v23  ;;  %v2496_v30 = vadd.f32 %v2495_v53, %v4537_v8  ;;  %v2497_v31 = vpop.f32.mrb[90].mxu1  ;;  %v3816_v23 = vmov (!%p3059_p0), 1983009808  }
 0x674   : > { %v2498_v51 = vadd.f32 %v2497_v31, %v4534_v33  ;;  %v2499_v4 = vpop.f32.mrb[91].mxu1  ;;  %v2562_v7 = vmax.f32 %v2494_v48, 0.0  ;;  %v2766_v26 = vunpack.c.l.s4 (!%p3059_p0), %v3816_v23 }
 0x675   : > { %v2500_v60 = vadd.f32 %v2499_v4, %v4537_v8  ;;  %v2563_v0 = vmax.f32 %v2496_v30, 0.0 }
 0x676   : > { %v2566_v38 = vmax.f32 %v2498_v51, 0.0  ;;  %v2767_v48 = vunpack.c.0.s8 (!%p3059_p0), %v2766_v26 }
 0x677   : > { %v2567_v17 = vmax.f32 %v2500_v60, 0.0 }
 0x678   : > { %v2602_v34 = vpack.c.bf16 %v2566_v38, %v2562_v7  ;;  %v2770_v31 = vsub.s32 (!%p3059_p0), %v2767_v48, %v4231_v13 }
 0x679   : > { %v2603_v12 = vpack.c.bf16 %v2567_v17, %v2563_v0  ;;  %v2503_v29 = vpop.f32.mrb[92].mxu1  ;;  %v2667_v2 = vld [vmem:[#allocation2 + $0xb0] sm:$0xff] (!%p3059_p0) }
 0x67a   : > { %2634 = vst [vmem:[#allocation2 + $0xd0] sm:$0xff] %v2602_v34  ;;  %v2504_v16 = vadd.f32 %v2503_v29, %v4534_v33  ;;  %v2505_v22 = vpop.f32.mrb[93].mxu1  ;;  %v2668_v46 = vld [vmem:[#allocation2 + $0xb8] sm:$0xff] (!%p3059_p0) }
 0x67b   : > { %2635 = vst [vmem:[#allocation2 + $0xd8] sm:$0xff] %v2603_v12  ;;  %v2506_v35 = vadd.f32 %v2505_v22, %v4537_v8  ;;  %v2507_v25 = vpop.f32.mrb[94].mxu1 }
 0x67c   : > { %v2508_v41 = vadd.f32 %v2507_v25, %v4534_v33  ;;  %v2509_v37 = vpop.f32.mrb[95].mxu1  ;;  %v2570_v27 = vmax.f32 %v2504_v16, 0.0  ;;  %v2647_v33 = vld [vmem:[#allocation2 + $0x10] sm:$0xff] (!%p3059_p0) }
 0x67d   : > { %v2510_v54 = vadd.f32 %v2509_v37, %v4537_v8  ;;  %v2571_v47 = vmax.f32 %v2506_v35, 0.0  ;;  %2643 = sbr.rel (%p3059_p0) target bundleno = 1912 (0x778), region = 68  ;;  %2719 = vmatpush1.bf16.msra.mxu1 (!%p3059_p0), %v2647_v33  ;;  %v2649_v8 = vld [vmem:[#allocation2 + $0x20] sm:$0xff] (!%p3059_p0) }
 0x67e   : > { %v2574_v10 = vmax.f32 %v2508_v41, 0.0  ;;  %2720 = vmatprep.subr.bf16.mxu1 (!%p3059_p0), %v2652_v58  ;;  %2680 = vmatpush1.bf16.msra.mxu0 (!%p3059_p0), %v2649_v8 }
 0x67f   : > { %v2575_v49 = vmax.f32 %v2510_v54, 0.0  ;;  %2681 = vmatprep.subr.bf16.mxu0 (!%p3059_p0), %v2654_v15 }
 0x680   : > { %v2606_v5 = vpack.c.bf16 %v2574_v10, %v2570_v27 }
 0x681   : > { %v2607_v40 = vpack.c.bf16 %v2575_v49, %v2571_v47  ;;  %2721 = vmatpush1.bf16.msra.mxu1 (!%p3059_p0), %v2651_v45  ;;  %v2671_v14 = vld [vmem:[#allocation2 + $0xd0] sm:$0xff] (!%p3059_p0) }
 0x682   : > { %2638 = vst [vmem:[#allocation2 + $0xf0] sm:$0xff] %v2606_v5  ;;  %2722 = vmatprep.subr.bf16.mxu1 (!%p3059_p0), %v2656_v50  ;;  %2682 = vmatpush1.bf16.msra.mxu0 (!%p3059_p0), %v2653_v32  ;;  %v2672_v11 = vld [vmem:[#allocation2 + $0xd8] sm:$0xff] (!%p3059_p0) }
 0x683   : > { %2639 = vst [vmem:[#allocation2 + $0xf8] sm:$0xff] %v2607_v40  ;;  %2683 = vmatprep.subr.bf16.mxu0 (!%p3059_p0), %v2658_v39 }
 0x685   : > { %2723 = vmatpush1.bf16.msra.mxu1 %v2655_v44 }
 0x686   : > { %2724 = vmatprep.subr.bf16.mxu1 %v2660_v59  ;;  %2684 = vmatpush1.bf16.msra.mxu0 %v2657_v24 }
 0x687   : > { %2685 = vmatprep.subr.bf16.mxu0 %v2662_v19 }
 0x689   : > { %2725 = vmatpush1.bf16.msra.mxu1 %v2659_v56  ;;  %v2675_v55 = vld [vmem:[#allocation2 + $0xf0] sm:$0xff] }
 0x68a   : > { %2726 = vmatprep.subr.bf16.mxu1 %v2664_v57  ;;  %2686 = vmatpush1.bf16.msra.mxu0 %v2661_v61  ;;  %v2676_v6 = vld [vmem:[#allocation2 + $0xf8] sm:$0xff] }
 0x68b   : > { %2687 = vmatprep.subr.bf16.mxu0 %v2666_v1 }
 0x68d   : > { %2727 = vmatpush1.bf16.msra.mxu1 %v2663_v9 }
 0x68e   : > { %2728 = vmatprep.subr.bf16.mxu1 %v2668_v46  ;;  %2688 = vmatpush1.bf16.msra.mxu0 %v2665_v42 }
 0x68f   : > { %2689 = vmatprep.subr.bf16.mxu0 %v2670_v62 }
 0x691   : > { %2729 = vmatpush1.bf16.msra.mxu1 %v2667_v2 }
 0x692   : > { %2730 = vmatprep.subr.bf16.mxu1 %v2672_v11  ;;  %2690 = vmatpush1.bf16.msra.mxu0 %v2669_v28 }
 0x693   : > { %2691 = vmatprep.subr.bf16.mxu0 %v2674_v18 }
 0x695   : > { %2731 = vmatpush1.bf16.msra.mxu1 %v2671_v14 }
 0x696   : > { %2732 = vmatprep.subr.bf16.mxu1 %v2676_v6  ;;  %2692 = vmatpush1.bf16.msra.mxu0 %v2673_v3 }
 0x699   : > { %2733 = vmatpush1.bf16.msra.mxu1 %v2675_v55  ;;  %2710 = vmatmul.mubr.bf16.vlgmr.msra.gmra.mrb[0].mxu0 %v2644_v21 }
 0x69c   : > { %2751 = vmatmul.mubr.bf16.vlgmr.msra.gmra.mrb[0].mxu1 %v2644_v21 }
 0x76c   : > { %v2711_v53 = vpop.f32.mrb[0].mxu0 }
 0x76d   : > { %v2713_v51 = vpop.f32.mrb[1].mxu0 }
 0x76e   : > { %v2763_v60 = vcombine.low %v2711_v53, %v2713_v51  ;;  %v2715_v38 = vpop.f32.mrb[2].mxu0 }
 0x76f   : > { %v2752_v30 = vpop.f32.mrb[0].mxu1  ;;  %v2716_v17 = vpop.f32.mrb[3].mxu0 }
 0x770   : > { %v2754_v4 = vpop.f32.mrb[1].mxu1  ;;  %v2771_v12 = vrot.slane %v2763_v60, %v2770_v31 }
 0x771   : > { %v2764_v7 = vcombine.low %v2752_v30, %v2754_v4  ;;  %v2756_v0 = vpop.f32.mrb[2].mxu1 }
 0x772   : > { %v2757_v34 = vpop.f32.mrb[3].mxu1 }
 0x773   : > { %v2778_v29 = vrot.slane %v2764_v7, %v2770_v31 }
 0x775   : > { %v2779_v16 = vcombine.low %v2771_v12, %v2778_v29 }
 0x777   : > { %2781 = vst [vmem:[#allocation13] sm:$0xff] %v2779_v16 }
 0x778 PF: > { %p3257_p3 = scmp.eq.s32.totalorder %s3872_s25, 2  ;;  %s3817_s24 = smov [#allocation13]  }
 0x779   : > { %s2789_s21 = sshll.u32 %s3817_s24, 4  ;;  %s2790_s21 = int_to_ptr.vmem [resolvable:$true] %s2789_s21 }
 0x77a   : > { %s3716_s19 = scalar_lea.vmem %s2790_s21, 128  ;;  %p3723_p7 = scmp.lt.s32.totalorder %s2790_s21, %s2790_s21 }
 0x77b   : > { %p3717_p6 = scmp.ne.s32.totalorder %s2790_s21, %s3716_s19  ;;  %p3724_p8 = scmp.lt.s32.totalorder %s3716_s19, %s3716_s19 }
 0x77d   : > { %p3718_p2 = pnand %p3717_p6, %p3257_p3  ;;  %p3725_p1 = por %p3724_p8, %p3723_p7 }
 0x77f   : > { %p3719_p11 = pneg %p3718_p2 }
 0x781   : > { %p3726_p4 = pnand %p3725_p1, %p3719_p11 }
 0x783   : > { %3729 = shalt.err (!%p3726_p4)
}
 0x784   : > { %s3730_s17 = scalar_lea.hbm %s4615_s6, 128 }
 0x785   : > { %p3731_p10 = scmp.ne.s32.totalorder %s4615_s6, %s3730_s17  ;;  %p3736_p13 = scmp.lt.u32.totalorder %s3730_s17, %s4615_s6 }
 0x787   : > { %p3732_p12 = pnand %p3731_p10, %p3257_p3 }
 0x789   : > { %p3733_p5 = pneg %p3732_p12 }
 0x78b   : > { %p3738_p9 = pnand %p3736_p13, %p3733_p5 }
 0x78d   : > { %3741 = shalt.err (!%p3738_p9)
}
 0x78e   : > { %3231 = dma.vmem_to_hbm [thread:$0]  (%p3257_p3), %s2790_s21, 128, %s4615_s6, [#allocation6]  }
 0x78f   : > { %3775 = dma.done.wait (%p3257_p3), [#allocation6], 128  }
 0x790   : > { %3777 = vsyncadd (%p3257_p3), [#allocation6], 4294967168 }
 0x791 PF: > { %p21_p0 = scmp.ge.s32.totalorder %s3897_s7, 5   ;;  %s4660_s21 = smov %s3784_s22 }
 0x792   : > { %s4661_s22 = smov %s3788_s23  ;;  %s4662_s23 = smov %s3929_s28 }
 0x793   : > { %s4663_s24 = smov %s3897_s7  ;;  %23 = sbr.rel (!%p21_p0) target bundleno = 10 (0xa), region = 125 }
 0x79a   :  { %2802 = vsyncpa [#allocation5], 1 }
 0x79b   :  { %2804 = vsyncpa [#allocation5 + $0x1], 1 }
 0x79c   :  { %2805 = vsyncpa [#allocation8], 1 }
 0x79d   :  { %2807 = vsyncpa [#allocation8 + $0x1], 1 }
 0x79e   :  { %2808 = vsyncpa [#allocation11], 1 }
 0x79f   :  { %2809 = vsyncpa [#allocation6], 1 }
 0x7a0   :  { %2811 = vsyncpa [#allocation6 + $0x1], 1 }
 0x7a1   :  { %2812 = vsyncmov [#allocation3] }
 0x7a4   :  { %s2813_s25 = vpop.sfrf %2812 }
 0x7a5   :  { %p3064_p3 = scmp.ne.s32.totalorder %s2813_s25, 0 }
 0x7a7   :  { %2817 = shalt.err (%p3064_p3)  }

</bundles_post_ra>
